<compile_context>
chip_gen: v6e
topology: v6e:2x2x1
jax: 0.10.0
libtpu: 0.0.40
codegen_flags: <defaults>
</compile_context>

<pallas_src>
import functools

import jax
import jax.numpy as jnp
import numpy as np
from jax.experimental import pallas as pl
from jax.experimental.pallas import tpu as pltpu


# ---------------------------------------------------------------------------
# Fused Pallas kernel: L stacked LSTM layers + Linear(hidden,3) on hn + softmax
# ---------------------------------------------------------------------------
def _fused_kernel(num_layers, B, T, x_ref, *refs):
    """refs = [wih_0, whh_0, b_0, ..., wih_{L-1}, whh_{L-1}, b_{L-1},
               w_out, b_out, out_ref, slab_0, slab_1]."""
    lstm_refs = refs[: 3 * num_layers]
    w_out_ref = refs[3 * num_layers]
    b_out_ref = refs[3 * num_layers + 1]
    out_ref = refs[3 * num_layers + 2]
    slabs = refs[3 * num_layers + 3: 3 * num_layers + 5]

    x_slab = x_ref[...]                                   # [T*B, Din], time-major f32
    hn_rows = []
    for layer in range(num_layers):
        wih = lstm_refs[3 * layer][...]                   # [Din_l, 4H]  gate order i,f,g,o
        whh = lstm_refs[3 * layer + 1][...]               # [H,     4H]
        b = lstm_refs[3 * layer + 2][...]                 # [1,     4H]  (= b_ih + b_hh)
        H = whh.shape[0]
        out_slab = slabs[layer % 2]                       # [T*B, H] VMEM scratch (ping-pong)

        # Hoisted input projection: one MXU op per layer, bias folded in.
        gx = jnp.dot(x_slab, wih, preferred_element_type=jnp.float32) + b   # [T*B, 4H]

        h = jnp.zeros((B, H), jnp.float32)
        c = jnp.zeros((B, H), jnp.float32)
        for t in range(T):                                # static, fully unrolled recurrence
            r0 = t * B                                    # contiguous time-major row slice
            gates = gx[r0:r0 + B, :] + jnp.dot(h, whh, preferred_element_type=jnp.float32)
            sig = jax.nn.sigmoid(gates)                   # full-width [B, 4H] EUP pass
            th = jnp.tanh(gates)                          # full-width [B, 4H] EUP pass
            i_g = sig[:, 0 * H:1 * H]
            f_g = sig[:, 1 * H:2 * H]
            g_g = th[:, 2 * H:3 * H]
            o_g = sig[:, 3 * H:4 * H]
            c = f_g * c + i_g * g_g
            h = o_g * jnp.tanh(c)
            out_slab[r0:r0 + B, :] = h                    # write h straight into the VMEM slab
        hn_rows.append(h)
        x_slab = out_slab[...]                            # next layer input, already [T*B, H]
        # TODO(synk): inter-layer dropout (module default dropout=0, so none applied)

    hn = jnp.concatenate(hn_rows, axis=0)                 # [L*B, H]
    logits = jnp.dot(hn, w_out_ref[...],
                     preferred_element_type=jnp.float32) + b_out_ref[...]   # [L*B, 3]
    m = jnp.max(logits, axis=-1, keepdims=True)
    e = jnp.exp(logits - m)
    probs = e / jnp.sum(e, axis=-1, keepdims=True)        # exact division (row-sum == 1)
    out_ref[...] = probs.reshape(num_layers, B, 3)        # softmax over dim=2


# ---------------------------------------------------------------------------
# Wrapper: one kernel launch for the whole forward pass
# ---------------------------------------------------------------------------
@jax.jit
def posdlxmert_forward(encodings, lstm_params, w_out, b_out):
    """encodings: [B, T, input_size] (batch_first, like the PyTorch module).

    lstm_params: list of (wih [Din,4H], whh [H,4H], b [1,4H]) per layer.
    w_out: [H, 3]; b_out: [1, 3].
    Returns softmax(hn @ w_out + b_out) of shape [num_layers, B, 3].
    """
    B, T, Din = encodings.shape
    num_layers = len(lstm_params)
    H = lstm_params[0][1].shape[0]
    # Wrapper-side layout plumbing: time-major [T*B, Din] slab (rows = t*B + b).
    x_tm = jnp.transpose(encodings, (1, 0, 2)).reshape(T * B, Din)
    flat = [w for triple in lstm_params for w in triple]
    n_in = 1 + len(flat) + 2
    kernel = functools.partial(_fused_kernel, num_layers, B, T)
    vmem_spec = pl.BlockSpec(memory_space=pltpu.MemorySpace.VMEM)
    return pl.pallas_call(
        kernel,
        out_shape=jax.ShapeDtypeStruct((num_layers, B, 3), jnp.float32),
        in_specs=[vmem_spec] * n_in,
        out_specs=vmem_spec,
        scratch_shapes=[pltpu.VMEM((T * B, H), jnp.float32),
                        pltpu.VMEM((T * B, H), jnp.float32)],
    )(x_tm, *flat, w_out, b_out)


# ---------------------------------------------------------------------------
# Pure-JAX reference (same math) for a correctness check
# ---------------------------------------------------------------------------
def reference_forward(encodings, lstm_params, w_out, b_out):
    B, T, _ = encodings.shape
    inp = encodings
    hn_layers = []
    for (wih, whh, b) in lstm_params:
        H = whh.shape[0]
        h = jnp.zeros((B, H), jnp.float32)
        c = jnp.zeros((B, H), jnp.float32)
        ys = []
        for t in range(T):
            gates = inp[:, t, :] @ wih + h @ whh + b
            i = jax.nn.sigmoid(gates[:, 0 * H:1 * H])
            f = jax.nn.sigmoid(gates[:, 1 * H:2 * H])
            g = jnp.tanh(gates[:, 2 * H:3 * H])
            o = jax.nn.sigmoid(gates[:, 3 * H:4 * H])
            c = f * c + i * g
            h = o * jnp.tanh(c)
            ys.append(h)
        inp = jnp.stack(ys, axis=1)
        hn_layers.append(h)
    hn = jnp.stack(hn_layers, axis=0)                 # [L, B, H]
    logits = jnp.einsum('lbh,hc->lbc', hn, w_out) + b_out
    return jax.nn.softmax(logits, axis=2)


# ---------------------------------------------------------------------------
# Deterministic parameter init + run
# ---------------------------------------------------------------------------
def init_params(key, input_size, hidden_size, num_layers):
    k = 1.0 / np.sqrt(hidden_size)
    lstm_params = []
    for layer in range(num_layers):
        d_in = input_size if layer == 0 else hidden_size
        key, k1, k2, k3, k4 = jax.random.split(key, 5)
        wih = jax.random.uniform(k1, (d_in, 4 * hidden_size), jnp.float32, -k, k)
        whh = jax.random.uniform(k2, (hidden_size, 4 * hidden_size), jnp.float32, -k, k)
        b_ih = jax.random.uniform(k3, (4 * hidden_size,), jnp.float32, -k, k)
        b_hh = jax.random.uniform(k4, (4 * hidden_size,), jnp.float32, -k, k)
        lstm_params.append((wih, whh, (b_ih + b_hh)[None, :]))
    key, k5, k6 = jax.random.split(key, 3)
    w_out = jax.random.uniform(k5, (hidden_size, 3), jnp.float32, -k, k)
    b_out = jax.random.uniform(k6, (3,), jnp.float32, -k, k)[None, :]
    return key, lstm_params, w_out, b_out


if __name__ == "__main__":
    B, T = 2, 8
    input_size, hidden_size, num_layers = 32, 32, 2

    key = jax.random.PRNGKey(0)
    key, lstm_params, w_out, b_out = init_params(key, input_size, hidden_size, num_layers)
    key, kx = jax.random.split(key)
    encodings = jax.random.normal(kx, (B, T, input_size), jnp.float32)

    out = posdlxmert_forward(encodings, lstm_params, w_out, b_out)
    out = jax.block_until_ready(out)

    ref = reference_forward(encodings, lstm_params, w_out, b_out)
    assert out.shape == (num_layers, B, 3), out.shape
    np.testing.assert_allclose(np.asarray(out), np.asarray(ref), rtol=1e-4, atol=1e-5)
    # softmax rows should sum to 1
    np.testing.assert_allclose(np.asarray(out).sum(-1), 1.0, rtol=1e-5, atol=1e-5)

    print("KERNEL_OK")
</pallas_src>

<mosaic_0001>
module attributes {stable_mosaic.version = 11 : i64} {
  func.func @_fused_kernel(%arg0: memref<16x32xf32, #tpu.memory_space<vmem>>, %arg1: memref<32x128xf32, #tpu.memory_space<vmem>>, %arg2: memref<32x128xf32, #tpu.memory_space<vmem>>, %arg3: memref<1x128xf32, #tpu.memory_space<vmem>>, %arg4: memref<32x128xf32, #tpu.memory_space<vmem>>, %arg5: memref<32x128xf32, #tpu.memory_space<vmem>>, %arg6: memref<1x128xf32, #tpu.memory_space<vmem>>, %arg7: memref<32x3xf32, #tpu.memory_space<vmem>>, %arg8: memref<1x3xf32, #tpu.memory_space<vmem>>, %arg9: memref<2x2x3xf32, #tpu.memory_space<vmem>>, %arg10: memref<16x32xf32, #tpu.memory_space<vmem>>, %arg11: memref<16x32xf32, #tpu.memory_space<vmem>>) attributes {dimension_semantics = [], scalar_prefetch = 0 : i64, scratch_operands = 2 : i64, tpu.core_type = #tpu.core_type<tc>} {
    %c0 = arith.constant 0 : index
    %c0_0 = arith.constant 0 : index
    %0 = vector.load %arg0[%c0, %c0_0] : memref<16x32xf32, #tpu.memory_space<vmem>>, vector<16x32xf32>
    %c0_1 = arith.constant 0 : index
    %c0_2 = arith.constant 0 : index
    %1 = vector.load %arg1[%c0_1, %c0_2] : memref<32x128xf32, #tpu.memory_space<vmem>>, vector<32x128xf32>
    %c0_3 = arith.constant 0 : index
    %c0_4 = arith.constant 0 : index
    %2 = vector.load %arg2[%c0_3, %c0_4] : memref<32x128xf32, #tpu.memory_space<vmem>>, vector<32x128xf32>
    %c0_5 = arith.constant 0 : index
    %c0_6 = arith.constant 0 : index
    %3 = vector.load %arg3[%c0_5, %c0_6] : memref<1x128xf32, #tpu.memory_space<vmem>>, vector<1x128xf32>
    %cst = arith.constant dense<0.000000e+00> : vector<16x128xf32>
    %4 = tpu.matmul %0, %1, %cst {dimension_numbers = #tpu.dot_dimension_numbers<[1], [0], [0], [1], [0, 0, 1, 1], [], []>} : vector<16x32xf32>, vector<32x128xf32>, vector<16x128xf32> -> vector<16x128xf32>
    %5 = vector.broadcast %3 : vector<1x128xf32> to vector<16x128xf32>
    %6 = arith.addf %4, %5 : vector<16x128xf32>
    %cst_7 = arith.constant 0.000000e+00 : f32
    %7 = vector.broadcast %cst_7 : f32 to vector<2x32xf32>
    %cst_8 = arith.constant 0.000000e+00 : f32
    %8 = vector.broadcast %cst_8 : f32 to vector<2x32xf32>
    %9 = vector.extract_strided_slice %6 {offsets = [0, 0], sizes = [2, 128], strides = [1, 1]} : vector<16x128xf32> to vector<2x128xf32>
    %cst_9 = arith.constant dense<0.000000e+00> : vector<2x128xf32>
    %10 = tpu.matmul %7, %2, %cst_9 {dimension_numbers = #tpu.dot_dimension_numbers<[1], [0], [0], [1], [0, 0, 1, 1], [], []>} : vector<2x32xf32>, vector<32x128xf32>, vector<2x128xf32> -> vector<2x128xf32>
    %11 = arith.addf %9, %10 : vector<2x128xf32>
    %12 = arith.negf %11 : vector<2x128xf32>
    %13 = math.exp %12 : vector<2x128xf32>
    %cst_10 = arith.constant 1.000000e+00 : f32
    %14 = vector.broadcast %cst_10 : f32 to vector<2x128xf32>
    %15 = arith.addf %14, %13 : vector<2x128xf32>
    %16 = arith.divf %14, %15 : vector<2x128xf32>
    %17 = math.tanh %11 : vector<2x128xf32>
    %18 = vector.extract_strided_slice %16 {offsets = [0, 0], sizes = [2, 32], strides = [1, 1]} : vector<2x128xf32> to vector<2x32xf32>
    %19 = vector.extract_strided_slice %16 {offsets = [0, 32], sizes = [2, 32], strides = [1, 1]} : vector<2x128xf32> to vector<2x32xf32>
    %20 = vector.extract_strided_slice %17 {offsets = [0, 64], sizes = [2, 32], strides = [1, 1]} : vector<2x128xf32> to vector<2x32xf32>
    %21 = vector.extract_strided_slice %16 {offsets = [0, 96], sizes = [2, 32], strides = [1, 1]} : vector<2x128xf32> to vector<2x32xf32>
    %22 = arith.mulf %19, %8 : vector<2x32xf32>
    %23 = arith.mulf %18, %20 : vector<2x32xf32>
    %24 = arith.addf %22, %23 : vector<2x32xf32>
    %25 = math.tanh %24 : vector<2x32xf32>
    %26 = arith.mulf %21, %25 : vector<2x32xf32>
    %c0_11 = arith.constant 0 : index
    %c0_12 = arith.constant 0 : index
    %27 = vector.load %arg10[%c0_11, %c0_12] : memref<16x32xf32, #tpu.memory_space<vmem>>, vector<2x32xf32>
    tpu.vector_store %arg10[%c0_11, %c0_12], %26 {strides = array<i32>} : memref<16x32xf32, #tpu.memory_space<vmem>>, vector<2x32xf32>,
    %28 = vector.extract_strided_slice %6 {offsets = [2, 0], sizes = [2, 128], strides = [1, 1]} : vector<16x128xf32> to vector<2x128xf32>
    %cst_13 = arith.constant dense<0.000000e+00> : vector<2x128xf32>
    %29 = tpu.matmul %26, %2, %cst_13 {dimension_numbers = #tpu.dot_dimension_numbers<[1], [0], [0], [1], [0, 0, 1, 1], [], []>} : vector<2x32xf32>, vector<32x128xf32>, vector<2x128xf32> -> vector<2x128xf32>
    %30 = arith.addf %28, %29 : vector<2x128xf32>
    %31 = arith.negf %30 : vector<2x128xf32>
    %32 = math.exp %31 : vector<2x128xf32>
    %cst_14 = arith.constant 1.000000e+00 : f32
    %33 = vector.broadcast %cst_14 : f32 to vector<2x128xf32>
    %34 = arith.addf %33, %32 : vector<2x128xf32>
    %35 = arith.divf %33, %34 : vector<2x128xf32>
    %36 = math.tanh %30 : vector<2x128xf32>
    %37 = vector.extract_strided_slice %35 {offsets = [0, 0], sizes = [2, 32], strides = [1, 1]} : vector<2x128xf32> to vector<2x32xf32>
    %38 = vector.extract_strided_slice %35 {offsets = [0, 32], sizes = [2, 32], strides = [1, 1]} : vector<2x128xf32> to vector<2x32xf32>
    %39 = vector.extract_strided_slice %36 {offsets = [0, 64], sizes = [2, 32], strides = [1, 1]} : vector<2x128xf32> to vector<2x32xf32>
    %40 = vector.extract_strided_slice %35 {offsets = [0, 96], sizes = [2, 32], strides = [1, 1]} : vector<2x128xf32> to vector<2x32xf32>
    %41 = arith.mulf %38, %24 : vector<2x32xf32>
    %42 = arith.mulf %37, %39 : vector<2x32xf32>
    %43 = arith.addf %41, %42 : vector<2x32xf32>
    %44 = math.tanh %43 : vector<2x32xf32>
    %45 = arith.mulf %40, %44 : vector<2x32xf32>
    %c2 = arith.constant 2 : index
    %c0_15 = arith.constant 0 : index
    %46 = vector.load %arg10[%c2, %c0_15] : memref<16x32xf32, #tpu.memory_space<vmem>>, vector<2x32xf32>
    tpu.vector_store %arg10[%c2, %c0_15], %45 {strides = array<i32>} : memref<16x32xf32, #tpu.memory_space<vmem>>, vector<2x32xf32>,
    %47 = vector.extract_strided_slice %6 {offsets = [4, 0], sizes = [2, 128], strides = [1, 1]} : vector<16x128xf32> to vector<2x128xf32>
    %cst_16 = arith.constant dense<0.000000e+00> : vector<2x128xf32>
    %48 = tpu.matmul %45, %2, %cst_16 {dimension_numbers = #tpu.dot_dimension_numbers<[1], [0], [0], [1], [0, 0, 1, 1], [], []>} : vector<2x32xf32>, vector<32x128xf32>, vector<2x128xf32> -> vector<2x128xf32>
    %49 = arith.addf %47, %48 : vector<2x128xf32>
    %50 = arith.negf %49 : vector<2x128xf32>
    %51 = math.exp %50 : vector<2x128xf32>
    %cst_17 = arith.constant 1.000000e+00 : f32
    %52 = vector.broadcast %cst_17 : f32 to vector<2x128xf32>
    %53 = arith.addf %52, %51 : vector<2x128xf32>
    %54 = arith.divf %52, %53 : vector<2x128xf32>
    %55 = math.tanh %49 : vector<2x128xf32>
    %56 = vector.extract_strided_slice %54 {offsets = [0, 0], sizes = [2, 32], strides = [1, 1]} : vector<2x128xf32> to vector<2x32xf32>
    %57 = vector.extract_strided_slice %54 {offsets = [0, 32], sizes = [2, 32], strides = [1, 1]} : vector<2x128xf32> to vector<2x32xf32>
    %58 = vector.extract_strided_slice %55 {offsets = [0, 64], sizes = [2, 32], strides = [1, 1]} : vector<2x128xf32> to vector<2x32xf32>
    %59 = vector.extract_strided_slice %54 {offsets = [0, 96], sizes = [2, 32], strides = [1, 1]} : vector<2x128xf32> to vector<2x32xf32>
    %60 = arith.mulf %57, %43 : vector<2x32xf32>
    %61 = arith.mulf %56, %58 : vector<2x32xf32>
    %62 = arith.addf %60, %61 : vector<2x32xf32>
    %63 = math.tanh %62 : vector<2x32xf32>
    %64 = arith.mulf %59, %63 : vector<2x32xf32>
    %c4 = arith.constant 4 : index
    %c0_18 = arith.constant 0 : index
    %65 = vector.load %arg10[%c4, %c0_18] : memref<16x32xf32, #tpu.memory_space<vmem>>, vector<2x32xf32>
    tpu.vector_store %arg10[%c4, %c0_18], %64 {strides = array<i32>} : memref<16x32xf32, #tpu.memory_space<vmem>>, vector<2x32xf32>,
    %66 = vector.extract_strided_slice %6 {offsets = [6, 0], sizes = [2, 128], strides = [1, 1]} : vector<16x128xf32> to vector<2x128xf32>
    %cst_19 = arith.constant dense<0.000000e+00> : vector<2x128xf32>
    %67 = tpu.matmul %64, %2, %cst_19 {dimension_numbers = #tpu.dot_dimension_numbers<[1], [0], [0], [1], [0, 0, 1, 1], [], []>} : vector<2x32xf32>, vector<32x128xf32>, vector<2x128xf32> -> vector<2x128xf32>
    %68 = arith.addf %66, %67 : vector<2x128xf32>
    %69 = arith.negf %68 : vector<2x128xf32>
    %70 = math.exp %69 : vector<2x128xf32>
    %cst_20 = arith.constant 1.000000e+00 : f32
    %71 = vector.broadcast %cst_20 : f32 to vector<2x128xf32>
    %72 = arith.addf %71, %70 : vector<2x128xf32>
    %73 = arith.divf %71, %72 : vector<2x128xf32>
    %74 = math.tanh %68 : vector<2x128xf32>
    %75 = vector.extract_strided_slice %73 {offsets = [0, 0], sizes = [2, 32], strides = [1, 1]} : vector<2x128xf32> to vector<2x32xf32>
    %76 = vector.extract_strided_slice %73 {offsets = [0, 32], sizes = [2, 32], strides = [1, 1]} : vector<2x128xf32> to vector<2x32xf32>
    %77 = vector.extract_strided_slice %74 {offsets = [0, 64], sizes = [2, 32], strides = [1, 1]} : vector<2x128xf32> to vector<2x32xf32>
    %78 = vector.extract_strided_slice %73 {offsets = [0, 96], sizes = [2, 32], strides = [1, 1]} : vector<2x128xf32> to vector<2x32xf32>
    %79 = arith.mulf %76, %62 : vector<2x32xf32>
    %80 = arith.mulf %75, %77 : vector<2x32xf32>
    %81 = arith.addf %79, %80 : vector<2x32xf32>
    %82 = math.tanh %81 : vector<2x32xf32>
    %83 = arith.mulf %78, %82 : vector<2x32xf32>
    %c6 = arith.constant 6 : index
    %c0_21 = arith.constant 0 : index
    %84 = vector.load %arg10[%c6, %c0_21] : memref<16x32xf32, #tpu.memory_space<vmem>>, vector<2x32xf32>
    tpu.vector_store %arg10[%c6, %c0_21], %83 {strides = array<i32>} : memref<16x32xf32, #tpu.memory_space<vmem>>, vector<2x32xf32>,
    %85 = vector.extract_strided_slice %6 {offsets = [8, 0], sizes = [2, 128], strides = [1, 1]} : vector<16x128xf32> to vector<2x128xf32>
    %cst_22 = arith.constant dense<0.000000e+00> : vector<2x128xf32>
    %86 = tpu.matmul %83, %2, %cst_22 {dimension_numbers = #tpu.dot_dimension_numbers<[1], [0], [0], [1], [0, 0, 1, 1], [], []>} : vector<2x32xf32>, vector<32x128xf32>, vector<2x128xf32> -> vector<2x128xf32>
    %87 = arith.addf %85, %86 : vector<2x128xf32>
    %88 = arith.negf %87 : vector<2x128xf32>
    %89 = math.exp %88 : vector<2x128xf32>
    %cst_23 = arith.constant 1.000000e+00 : f32
    %90 = vector.broadcast %cst_23 : f32 to vector<2x128xf32>
    %91 = arith.addf %90, %89 : vector<2x128xf32>
    %92 = arith.divf %90, %91 : vector<2x128xf32>
    %93 = math.tanh %87 : vector<2x128xf32>
    %94 = vector.extract_strided_slice %92 {offsets = [0, 0], sizes = [2, 32], strides = [1, 1]} : vector<2x128xf32> to vector<2x32xf32>
    %95 = vector.extract_strided_slice %92 {offsets = [0, 32], sizes = [2, 32], strides = [1, 1]} : vector<2x128xf32> to vector<2x32xf32>
    %96 = vector.extract_strided_slice %93 {offsets = [0, 64], sizes = [2, 32], strides = [1, 1]} : vector<2x128xf32> to vector<2x32xf32>
    %97 = vector.extract_strided_slice %92 {offsets = [0, 96], sizes = [2, 32], strides = [1, 1]} : vector<2x128xf32> to vector<2x32xf32>
    %98 = arith.mulf %95, %81 : vector<2x32xf32>
    %99 = arith.mulf %94, %96 : vector<2x32xf32>
    %100 = arith.addf %98, %99 : vector<2x32xf32>
    %101 = math.tanh %100 : vector<2x32xf32>
    %102 = arith.mulf %97, %101 : vector<2x32xf32>
    %c8 = arith.constant 8 : index
    %c0_24 = arith.constant 0 : index
    %103 = vector.load %arg10[%c8, %c0_24] : memref<16x32xf32, #tpu.memory_space<vmem>>, vector<2x32xf32>
    tpu.vector_store %arg10[%c8, %c0_24], %102 {strides = array<i32>} : memref<16x32xf32, #tpu.memory_space<vmem>>, vector<2x32xf32>,
    %104 = vector.extract_strided_slice %6 {offsets = [10, 0], sizes = [2, 128], strides = [1, 1]} : vector<16x128xf32> to vector<2x128xf32>
    %cst_25 = arith.constant dense<0.000000e+00> : vector<2x128xf32>
    %105 = tpu.matmul %102, %2, %cst_25 {dimension_numbers = #tpu.dot_dimension_numbers<[1], [0], [0], [1], [0, 0, 1, 1], [], []>} : vector<2x32xf32>, vector<32x128xf32>, vector<2x128xf32> -> vector<2x128xf32>
    %106 = arith.addf %104, %105 : vector<2x128xf32>
    %107 = arith.negf %106 : vector<2x128xf32>
    %108 = math.exp %107 : vector<2x128xf32>
    %cst_26 = arith.constant 1.000000e+00 : f32
    %109 = vector.broadcast %cst_26 : f32 to vector<2x128xf32>
    %110 = arith.addf %109, %108 : vector<2x128xf32>
    %111 = arith.divf %109, %110 : vector<2x128xf32>
    %112 = math.tanh %106 : vector<2x128xf32>
    %113 = vector.extract_strided_slice %111 {offsets = [0, 0], sizes = [2, 32], strides = [1, 1]} : vector<2x128xf32> to vector<2x32xf32>
    %114 = vector.extract_strided_slice %111 {offsets = [0, 32], sizes = [2, 32], strides = [1, 1]} : vector<2x128xf32> to vector<2x32xf32>
    %115 = vector.extract_strided_slice %112 {offsets = [0, 64], sizes = [2, 32], strides = [1, 1]} : vector<2x128xf32> to vector<2x32xf32>
    %116 = vector.extract_strided_slice %111 {offsets = [0, 96], sizes = [2, 32], strides = [1, 1]} : vector<2x128xf32> to vector<2x32xf32>
    %117 = arith.mulf %114, %100 : vector<2x32xf32>
    %118 = arith.mulf %113, %115 : vector<2x32xf32>
    %119 = arith.addf %117, %118 : vector<2x32xf32>
    %120 = math.tanh %119 : vector<2x32xf32>
    %121 = arith.mulf %116, %120 : vector<2x32xf32>
    %c10 = arith.constant 10 : index
    %c0_27 = arith.constant 0 : index
    %122 = vector.load %arg10[%c10, %c0_27] : memref<16x32xf32, #tpu.memory_space<vmem>>, vector<2x32xf32>
    tpu.vector_store %arg10[%c10, %c0_27], %121 {strides = array<i32>} : memref<16x32xf32, #tpu.memory_space<vmem>>, vector<2x32xf32>,
    %123 = vector.extract_strided_slice %6 {offsets = [12, 0], sizes = [2, 128], strides = [1, 1]} : vector<16x128xf32> to vector<2x128xf32>
    %cst_28 = arith.constant dense<0.000000e+00> : vector<2x128xf32>
    %124 = tpu.matmul %121, %2, %cst_28 {dimension_numbers = #tpu.dot_dimension_numbers<[1], [0], [0], [1], [0, 0, 1, 1], [], []>} : vector<2x32xf32>, vector<32x128xf32>, vector<2x128xf32> -> vector<2x128xf32>
    %125 = arith.addf %123, %124 : vector<2x128xf32>
    %126 = arith.negf %125 : vector<2x128xf32>
    %127 = math.exp %126 : vector<2x128xf32>
    %cst_29 = arith.constant 1.000000e+00 : f32
    %128 = vector.broadcast %cst_29 : f32 to vector<2x128xf32>
    %129 = arith.addf %128, %127 : vector<2x128xf32>
    %130 = arith.divf %128, %129 : vector<2x128xf32>
    %131 = math.tanh %125 : vector<2x128xf32>
    %132 = vector.extract_strided_slice %130 {offsets = [0, 0], sizes = [2, 32], strides = [1, 1]} : vector<2x128xf32> to vector<2x32xf32>
    %133 = vector.extract_strided_slice %130 {offsets = [0, 32], sizes = [2, 32], strides = [1, 1]} : vector<2x128xf32> to vector<2x32xf32>
    %134 = vector.extract_strided_slice %131 {offsets = [0, 64], sizes = [2, 32], strides = [1, 1]} : vector<2x128xf32> to vector<2x32xf32>
    %135 = vector.extract_strided_slice %130 {offsets = [0, 96], sizes = [2, 32], strides = [1, 1]} : vector<2x128xf32> to vector<2x32xf32>
    %136 = arith.mulf %133, %119 : vector<2x32xf32>
    %137 = arith.mulf %132, %134 : vector<2x32xf32>
    %138 = arith.addf %136, %137 : vector<2x32xf32>
    %139 = math.tanh %138 : vector<2x32xf32>
    %140 = arith.mulf %135, %139 : vector<2x32xf32>
    %c12 = arith.constant 12 : index
    %c0_30 = arith.constant 0 : index
    %141 = vector.load %arg10[%c12, %c0_30] : memref<16x32xf32, #tpu.memory_space<vmem>>, vector<2x32xf32>
    tpu.vector_store %arg10[%c12, %c0_30], %140 {strides = array<i32>} : memref<16x32xf32, #tpu.memory_space<vmem>>, vector<2x32xf32>,
    %142 = vector.extract_strided_slice %6 {offsets = [14, 0], sizes = [2, 128], strides = [1, 1]} : vector<16x128xf32> to vector<2x128xf32>
    %cst_31 = arith.constant dense<0.000000e+00> : vector<2x128xf32>
    %143 = tpu.matmul %140, %2, %cst_31 {dimension_numbers = #tpu.dot_dimension_numbers<[1], [0], [0], [1], [0, 0, 1, 1], [], []>} : vector<2x32xf32>, vector<32x128xf32>, vector<2x128xf32> -> vector<2x128xf32>
    %144 = arith.addf %142, %143 : vector<2x128xf32>
    %145 = arith.negf %144 : vector<2x128xf32>
    %146 = math.exp %145 : vector<2x128xf32>
    %cst_32 = arith.constant 1.000000e+00 : f32
    %147 = vector.broadcast %cst_32 : f32 to vector<2x128xf32>
    %148 = arith.addf %147, %146 : vector<2x128xf32>
    %149 = arith.divf %147, %148 : vector<2x128xf32>
    %150 = math.tanh %144 : vector<2x128xf32>
    %151 = vector.extract_strided_slice %149 {offsets = [0, 0], sizes = [2, 32], strides = [1, 1]} : vector<2x128xf32> to vector<2x32xf32>
    %152 = vector.extract_strided_slice %149 {offsets = [0, 32], sizes = [2, 32], strides = [1, 1]} : vector<2x128xf32> to vector<2x32xf32>
    %153 = vector.extract_strided_slice %150 {offsets = [0, 64], sizes = [2, 32], strides = [1, 1]} : vector<2x128xf32> to vector<2x32xf32>
    %154 = vector.extract_strided_slice %149 {offsets = [0, 96], sizes = [2, 32], strides = [1, 1]} : vector<2x128xf32> to vector<2x32xf32>
    %155 = arith.mulf %152, %138 : vector<2x32xf32>
    %156 = arith.mulf %151, %153 : vector<2x32xf32>
    %157 = arith.addf %155, %156 : vector<2x32xf32>
    %158 = math.tanh %157 : vector<2x32xf32>
    %159 = arith.mulf %154, %158 : vector<2x32xf32>
    %c14 = arith.constant 14 : index
    %c0_33 = arith.constant 0 : index
    %160 = vector.load %arg10[%c14, %c0_33] : memref<16x32xf32, #tpu.memory_space<vmem>>, vector<2x32xf32>
    tpu.vector_store %arg10[%c14, %c0_33], %159 {strides = array<i32>} : memref<16x32xf32, #tpu.memory_space<vmem>>, vector<2x32xf32>,
    %c0_34 = arith.constant 0 : index
    %c0_35 = arith.constant 0 : index
    %161 = vector.load %arg10[%c0_34, %c0_35] : memref<16x32xf32, #tpu.memory_space<vmem>>, vector<16x32xf32>
    %c0_36 = arith.constant 0 : index
    %c0_37 = arith.constant 0 : index
    %162 = vector.load %arg4[%c0_36, %c0_37] : memref<32x128xf32, #tpu.memory_space<vmem>>, vector<32x128xf32>
    %c0_38 = arith.constant 0 : index
    %c0_39 = arith.constant 0 : index
    %163 = vector.load %arg5[%c0_38, %c0_39] : memref<32x128xf32, #tpu.memory_space<vmem>>, vector<32x128xf32>
    %c0_40 = arith.constant 0 : index
    %c0_41 = arith.constant 0 : index
    %164 = vector.load %arg6[%c0_40, %c0_41] : memref<1x128xf32, #tpu.memory_space<vmem>>, vector<1x128xf32>
    %cst_42 = arith.constant dense<0.000000e+00> : vector<16x128xf32>
    %165 = tpu.matmul %161, %162, %cst_42 {dimension_numbers = #tpu.dot_dimension_numbers<[1], [0], [0], [1], [0, 0, 1, 1], [], []>} : vector<16x32xf32>, vector<32x128xf32>, vector<16x128xf32> -> vector<16x128xf32>
    %166 = vector.broadcast %164 : vector<1x128xf32> to vector<16x128xf32>
    %167 = arith.addf %165, %166 : vector<16x128xf32>
    %cst_43 = arith.constant 0.000000e+00 : f32
    %168 = vector.broadcast %cst_43 : f32 to vector<2x32xf32>
    %cst_44 = arith.constant 0.000000e+00 : f32
    %169 = vector.broadcast %cst_44 : f32 to vector<2x32xf32>
    %170 = vector.extract_strided_slice %167 {offsets = [0, 0], sizes = [2, 128], strides = [1, 1]} : vector<16x128xf32> to vector<2x128xf32>
    %cst_45 = arith.constant dense<0.000000e+00> : vector<2x128xf32>
    %171 = tpu.matmul %168, %163, %cst_45 {dimension_numbers = #tpu.dot_dimension_numbers<[1], [0], [0], [1], [0, 0, 1, 1], [], []>} : vector<2x32xf32>, vector<32x128xf32>, vector<2x128xf32> -> vector<2x128xf32>
    %172 = arith.addf %170, %171 : vector<2x128xf32>
    %173 = arith.negf %172 : vector<2x128xf32>
    %174 = math.exp %173 : vector<2x128xf32>
    %cst_46 = arith.constant 1.000000e+00 : f32
    %175 = vector.broadcast %cst_46 : f32 to vector<2x128xf32>
    %176 = arith.addf %175, %174 : vector<2x128xf32>
    %177 = arith.divf %175, %176 : vector<2x128xf32>
    %178 = math.tanh %172 : vector<2x128xf32>
    %179 = vector.extract_strided_slice %177 {offsets = [0, 0], sizes = [2, 32], strides = [1, 1]} : vector<2x128xf32> to vector<2x32xf32>
    %180 = vector.extract_strided_slice %177 {offsets = [0, 32], sizes = [2, 32], strides = [1, 1]} : vector<2x128xf32> to vector<2x32xf32>
    %181 = vector.extract_strided_slice %178 {offsets = [0, 64], sizes = [2, 32], strides = [1, 1]} : vector<2x128xf32> to vector<2x32xf32>
    %182 = vector.extract_strided_slice %177 {offsets = [0, 96], sizes = [2, 32], strides = [1, 1]} : vector<2x128xf32> to vector<2x32xf32>
    %183 = arith.mulf %180, %169 : vector<2x32xf32>
    %184 = arith.mulf %179, %181 : vector<2x32xf32>
    %185 = arith.addf %183, %184 : vector<2x32xf32>
    %186 = math.tanh %185 : vector<2x32xf32>
    %187 = arith.mulf %182, %186 : vector<2x32xf32>
    %c0_47 = arith.constant 0 : index
    %c0_48 = arith.constant 0 : index
    %188 = vector.load %arg11[%c0_47, %c0_48] : memref<16x32xf32, #tpu.memory_space<vmem>>, vector<2x32xf32>
    tpu.vector_store %arg11[%c0_47, %c0_48], %187 {strides = array<i32>} : memref<16x32xf32, #tpu.memory_space<vmem>>, vector<2x32xf32>,
    %189 = vector.extract_strided_slice %167 {offsets = [2, 0], sizes = [2, 128], strides = [1, 1]} : vector<16x128xf32> to vector<2x128xf32>
    %cst_49 = arith.constant dense<0.000000e+00> : vector<2x128xf32>
    %190 = tpu.matmul %187, %163, %cst_49 {dimension_numbers = #tpu.dot_dimension_numbers<[1], [0], [0], [1], [0, 0, 1, 1], [], []>} : vector<2x32xf32>, vector<32x128xf32>, vector<2x128xf32> -> vector<2x128xf32>
    %191 = arith.addf %189, %190 : vector<2x128xf32>
    %192 = arith.negf %191 : vector<2x128xf32>
    %193 = math.exp %192 : vector<2x128xf32>
    %cst_50 = arith.constant 1.000000e+00 : f32
    %194 = vector.broadcast %cst_50 : f32 to vector<2x128xf32>
    %195 = arith.addf %194, %193 : vector<2x128xf32>
    %196 = arith.divf %194, %195 : vector<2x128xf32>
    %197 = math.tanh %191 : vector<2x128xf32>
    %198 = vector.extract_strided_slice %196 {offsets = [0, 0], sizes = [2, 32], strides = [1, 1]} : vector<2x128xf32> to vector<2x32xf32>
    %199 = vector.extract_strided_slice %196 {offsets = [0, 32], sizes = [2, 32], strides = [1, 1]} : vector<2x128xf32> to vector<2x32xf32>
    %200 = vector.extract_strided_slice %197 {offsets = [0, 64], sizes = [2, 32], strides = [1, 1]} : vector<2x128xf32> to vector<2x32xf32>
    %201 = vector.extract_strided_slice %196 {offsets = [0, 96], sizes = [2, 32], strides = [1, 1]} : vector<2x128xf32> to vector<2x32xf32>
    %202 = arith.mulf %199, %185 : vector<2x32xf32>
    %203 = arith.mulf %198, %200 : vector<2x32xf32>
    %204 = arith.addf %202, %203 : vector<2x32xf32>
    %205 = math.tanh %204 : vector<2x32xf32>
    %206 = arith.mulf %201, %205 : vector<2x32xf32>
    %c2_51 = arith.constant 2 : index
    %c0_52 = arith.constant 0 : index
    %207 = vector.load %arg11[%c2_51, %c0_52] : memref<16x32xf32, #tpu.memory_space<vmem>>, vector<2x32xf32>
    tpu.vector_store %arg11[%c2_51, %c0_52], %206 {strides = array<i32>} : memref<16x32xf32, #tpu.memory_space<vmem>>, vector<2x32xf32>,
    %208 = vector.extract_strided_slice %167 {offsets = [4, 0], sizes = [2, 128], strides = [1, 1]} : vector<16x128xf32> to vector<2x128xf32>
    %cst_53 = arith.constant dense<0.000000e+00> : vector<2x128xf32>
    %209 = tpu.matmul %206, %163, %cst_53 {dimension_numbers = #tpu.dot_dimension_numbers<[1], [0], [0], [1], [0, 0, 1, 1], [], []>} : vector<2x32xf32>, vector<32x128xf32>, vector<2x128xf32> -> vector<2x128xf32>
    %210 = arith.addf %208, %209 : vector<2x128xf32>
    %211 = arith.negf %210 : vector<2x128xf32>
    %212 = math.exp %211 : vector<2x128xf32>
    %cst_54 = arith.constant 1.000000e+00 : f32
    %213 = vector.broadcast %cst_54 : f32 to vector<2x128xf32>
    %214 = arith.addf %213, %212 : vector<2x128xf32>
    %215 = arith.divf %213, %214 : vector<2x128xf32>
    %216 = math.tanh %210 : vector<2x128xf32>
    %217 = vector.extract_strided_slice %215 {offsets = [0, 0], sizes = [2, 32], strides = [1, 1]} : vector<2x128xf32> to vector<2x32xf32>
    %218 = vector.extract_strided_slice %215 {offsets = [0, 32], sizes = [2, 32], strides = [1, 1]} : vector<2x128xf32> to vector<2x32xf32>
    %219 = vector.extract_strided_slice %216 {offsets = [0, 64], sizes = [2, 32], strides = [1, 1]} : vector<2x128xf32> to vector<2x32xf32>
    %220 = vector.extract_strided_slice %215 {offsets = [0, 96], sizes = [2, 32], strides = [1, 1]} : vector<2x128xf32> to vector<2x32xf32>
    %221 = arith.mulf %218, %204 : vector<2x32xf32>
    %222 = arith.mulf %217, %219 : vector<2x32xf32>
    %223 = arith.addf %221, %222 : vector<2x32xf32>
    %224 = math.tanh %223 : vector<2x32xf32>
    %225 = arith.mulf %220, %224 : vector<2x32xf32>
    %c4_55 = arith.constant 4 : index
    %c0_56 = arith.constant 0 : index
    %226 = vector.load %arg11[%c4_55, %c0_56] : memref<16x32xf32, #tpu.memory_space<vmem>>, vector<2x32xf32>
    tpu.vector_store %arg11[%c4_55, %c0_56], %225 {strides = array<i32>} : memref<16x32xf32, #tpu.memory_space<vmem>>, vector<2x32xf32>,
    %227 = vector.extract_strided_slice %167 {offsets = [6, 0], sizes = [2, 128], strides = [1, 1]} : vector<16x128xf32> to vector<2x128xf32>
    %cst_57 = arith.constant dense<0.000000e+00> : vector<2x128xf32>
    %228 = tpu.matmul %225, %163, %cst_57 {dimension_numbers = #tpu.dot_dimension_numbers<[1], [0], [0], [1], [0, 0, 1, 1], [], []>} : vector<2x32xf32>, vector<32x128xf32>, vector<2x128xf32> -> vector<2x128xf32>
    %229 = arith.addf %227, %228 : vector<2x128xf32>
    %230 = arith.negf %229 : vector<2x128xf32>
    %231 = math.exp %230 : vector<2x128xf32>
    %cst_58 = arith.constant 1.000000e+00 : f32
    %232 = vector.broadcast %cst_58 : f32 to vector<2x128xf32>
    %233 = arith.addf %232, %231 : vector<2x128xf32>
    %234 = arith.divf %232, %233 : vector<2x128xf32>
    %235 = math.tanh %229 : vector<2x128xf32>
    %236 = vector.extract_strided_slice %234 {offsets = [0, 0], sizes = [2, 32], strides = [1, 1]} : vector<2x128xf32> to vector<2x32xf32>
    %237 = vector.extract_strided_slice %234 {offsets = [0, 32], sizes = [2, 32], strides = [1, 1]} : vector<2x128xf32> to vector<2x32xf32>
    %238 = vector.extract_strided_slice %235 {offsets = [0, 64], sizes = [2, 32], strides = [1, 1]} : vector<2x128xf32> to vector<2x32xf32>
    %239 = vector.extract_strided_slice %234 {offsets = [0, 96], sizes = [2, 32], strides = [1, 1]} : vector<2x128xf32> to vector<2x32xf32>
    %240 = arith.mulf %237, %223 : vector<2x32xf32>
    %241 = arith.mulf %236, %238 : vector<2x32xf32>
    %242 = arith.addf %240, %241 : vector<2x32xf32>
    %243 = math.tanh %242 : vector<2x32xf32>
    %244 = arith.mulf %239, %243 : vector<2x32xf32>
    %c6_59 = arith.constant 6 : index
    %c0_60 = arith.constant 0 : index
    %245 = vector.load %arg11[%c6_59, %c0_60] : memref<16x32xf32, #tpu.memory_space<vmem>>, vector<2x32xf32>
    tpu.vector_store %arg11[%c6_59, %c0_60], %244 {strides = array<i32>} : memref<16x32xf32, #tpu.memory_space<vmem>>, vector<2x32xf32>,
    %246 = vector.extract_strided_slice %167 {offsets = [8, 0], sizes = [2, 128], strides = [1, 1]} : vector<16x128xf32> to vector<2x128xf32>
    %cst_61 = arith.constant dense<0.000000e+00> : vector<2x128xf32>
    %247 = tpu.matmul %244, %163, %cst_61 {dimension_numbers = #tpu.dot_dimension_numbers<[1], [0], [0], [1], [0, 0, 1, 1], [], []>} : vector<2x32xf32>, vector<32x128xf32>, vector<2x128xf32> -> vector<2x128xf32>
    %248 = arith.addf %246, %247 : vector<2x128xf32>
    %249 = arith.negf %248 : vector<2x128xf32>
    %250 = math.exp %249 : vector<2x128xf32>
    %cst_62 = arith.constant 1.000000e+00 : f32
    %251 = vector.broadcast %cst_62 : f32 to vector<2x128xf32>
    %252 = arith.addf %251, %250 : vector<2x128xf32>
    %253 = arith.divf %251, %252 : vector<2x128xf32>
    %254 = math.tanh %248 : vector<2x128xf32>
    %255 = vector.extract_strided_slice %253 {offsets = [0, 0], sizes = [2, 32], strides = [1, 1]} : vector<2x128xf32> to vector<2x32xf32>
    %256 = vector.extract_strided_slice %253 {offsets = [0, 32], sizes = [2, 32], strides = [1, 1]} : vector<2x128xf32> to vector<2x32xf32>
    %257 = vector.extract_strided_slice %254 {offsets = [0, 64], sizes = [2, 32], strides = [1, 1]} : vector<2x128xf32> to vector<2x32xf32>
    %258 = vector.extract_strided_slice %253 {offsets = [0, 96], sizes = [2, 32], strides = [1, 1]} : vector<2x128xf32> to vector<2x32xf32>
    %259 = arith.mulf %256, %242 : vector<2x32xf32>
    %260 = arith.mulf %255, %257 : vector<2x32xf32>
    %261 = arith.addf %259, %260 : vector<2x32xf32>
    %262 = math.tanh %261 : vector<2x32xf32>
    %263 = arith.mulf %258, %262 : vector<2x32xf32>
    %c8_63 = arith.constant 8 : index
    %c0_64 = arith.constant 0 : index
    %264 = vector.load %arg11[%c8_63, %c0_64] : memref<16x32xf32, #tpu.memory_space<vmem>>, vector<2x32xf32>
    tpu.vector_store %arg11[%c8_63, %c0_64], %263 {strides = array<i32>} : memref<16x32xf32, #tpu.memory_space<vmem>>, vector<2x32xf32>,
    %265 = vector.extract_strided_slice %167 {offsets = [10, 0], sizes = [2, 128], strides = [1, 1]} : vector<16x128xf32> to vector<2x128xf32>
    %cst_65 = arith.constant dense<0.000000e+00> : vector<2x128xf32>
    %266 = tpu.matmul %263, %163, %cst_65 {dimension_numbers = #tpu.dot_dimension_numbers<[1], [0], [0], [1], [0, 0, 1, 1], [], []>} : vector<2x32xf32>, vector<32x128xf32>, vector<2x128xf32> -> vector<2x128xf32>
    %267 = arith.addf %265, %266 : vector<2x128xf32>
    %268 = arith.negf %267 : vector<2x128xf32>
    %269 = math.exp %268 : vector<2x128xf32>
    %cst_66 = arith.constant 1.000000e+00 : f32
    %270 = vector.broadcast %cst_66 : f32 to vector<2x128xf32>
    %271 = arith.addf %270, %269 : vector<2x128xf32>
    %272 = arith.divf %270, %271 : vector<2x128xf32>
    %273 = math.tanh %267 : vector<2x128xf32>
    %274 = vector.extract_strided_slice %272 {offsets = [0, 0], sizes = [2, 32], strides = [1, 1]} : vector<2x128xf32> to vector<2x32xf32>
    %275 = vector.extract_strided_slice %272 {offsets = [0, 32], sizes = [2, 32], strides = [1, 1]} : vector<2x128xf32> to vector<2x32xf32>
    %276 = vector.extract_strided_slice %273 {offsets = [0, 64], sizes = [2, 32], strides = [1, 1]} : vector<2x128xf32> to vector<2x32xf32>
    %277 = vector.extract_strided_slice %272 {offsets = [0, 96], sizes = [2, 32], strides = [1, 1]} : vector<2x128xf32> to vector<2x32xf32>
    %278 = arith.mulf %275, %261 : vector<2x32xf32>
    %279 = arith.mulf %274, %276 : vector<2x32xf32>
    %280 = arith.addf %278, %279 : vector<2x32xf32>
    %281 = math.tanh %280 : vector<2x32xf32>
    %282 = arith.mulf %277, %281 : vector<2x32xf32>
    %c10_67 = arith.constant 10 : index
    %c0_68 = arith.constant 0 : index
    %283 = vector.load %arg11[%c10_67, %c0_68] : memref<16x32xf32, #tpu.memory_space<vmem>>, vector<2x32xf32>
    tpu.vector_store %arg11[%c10_67, %c0_68], %282 {strides = array<i32>} : memref<16x32xf32, #tpu.memory_space<vmem>>, vector<2x32xf32>,
    %284 = vector.extract_strided_slice %167 {offsets = [12, 0], sizes = [2, 128], strides = [1, 1]} : vector<16x128xf32> to vector<2x128xf32>
    %cst_69 = arith.constant dense<0.000000e+00> : vector<2x128xf32>
    %285 = tpu.matmul %282, %163, %cst_69 {dimension_numbers = #tpu.dot_dimension_numbers<[1], [0], [0], [1], [0, 0, 1, 1], [], []>} : vector<2x32xf32>, vector<32x128xf32>, vector<2x128xf32> -> vector<2x128xf32>
    %286 = arith.addf %284, %285 : vector<2x128xf32>
    %287 = arith.negf %286 : vector<2x128xf32>
    %288 = math.exp %287 : vector<2x128xf32>
    %cst_70 = arith.constant 1.000000e+00 : f32
    %289 = vector.broadcast %cst_70 : f32 to vector<2x128xf32>
    %290 = arith.addf %289, %288 : vector<2x128xf32>
    %291 = arith.divf %289, %290 : vector<2x128xf32>
    %292 = math.tanh %286 : vector<2x128xf32>
    %293 = vector.extract_strided_slice %291 {offsets = [0, 0], sizes = [2, 32], strides = [1, 1]} : vector<2x128xf32> to vector<2x32xf32>
    %294 = vector.extract_strided_slice %291 {offsets = [0, 32], sizes = [2, 32], strides = [1, 1]} : vector<2x128xf32> to vector<2x32xf32>
    %295 = vector.extract_strided_slice %292 {offsets = [0, 64], sizes = [2, 32], strides = [1, 1]} : vector<2x128xf32> to vector<2x32xf32>
    %296 = vector.extract_strided_slice %291 {offsets = [0, 96], sizes = [2, 32], strides = [1, 1]} : vector<2x128xf32> to vector<2x32xf32>
    %297 = arith.mulf %294, %280 : vector<2x32xf32>
    %298 = arith.mulf %293, %295 : vector<2x32xf32>
    %299 = arith.addf %297, %298 : vector<2x32xf32>
    %300 = math.tanh %299 : vector<2x32xf32>
    %301 = arith.mulf %296, %300 : vector<2x32xf32>
    %c12_71 = arith.constant 12 : index
    %c0_72 = arith.constant 0 : index
    %302 = vector.load %arg11[%c12_71, %c0_72] : memref<16x32xf32, #tpu.memory_space<vmem>>, vector<2x32xf32>
    tpu.vector_store %arg11[%c12_71, %c0_72], %301 {strides = array<i32>} : memref<16x32xf32, #tpu.memory_space<vmem>>, vector<2x32xf32>,
    %303 = vector.extract_strided_slice %167 {offsets = [14, 0], sizes = [2, 128], strides = [1, 1]} : vector<16x128xf32> to vector<2x128xf32>
    %cst_73 = arith.constant dense<0.000000e+00> : vector<2x128xf32>
    %304 = tpu.matmul %301, %163, %cst_73 {dimension_numbers = #tpu.dot_dimension_numbers<[1], [0], [0], [1], [0, 0, 1, 1], [], []>} : vector<2x32xf32>, vector<32x128xf32>, vector<2x128xf32> -> vector<2x128xf32>
    %305 = arith.addf %303, %304 : vector<2x128xf32>
    %306 = arith.negf %305 : vector<2x128xf32>
    %307 = math.exp %306 : vector<2x128xf32>
    %cst_74 = arith.constant 1.000000e+00 : f32
    %308 = vector.broadcast %cst_74 : f32 to vector<2x128xf32>
    %309 = arith.addf %308, %307 : vector<2x128xf32>
    %310 = arith.divf %308, %309 : vector<2x128xf32>
    %311 = math.tanh %305 : vector<2x128xf32>
    %312 = vector.extract_strided_slice %310 {offsets = [0, 0], sizes = [2, 32], strides = [1, 1]} : vector<2x128xf32> to vector<2x32xf32>
    %313 = vector.extract_strided_slice %310 {offsets = [0, 32], sizes = [2, 32], strides = [1, 1]} : vector<2x128xf32> to vector<2x32xf32>
    %314 = vector.extract_strided_slice %311 {offsets = [0, 64], sizes = [2, 32], strides = [1, 1]} : vector<2x128xf32> to vector<2x32xf32>
    %315 = vector.extract_strided_slice %310 {offsets = [0, 96], sizes = [2, 32], strides = [1, 1]} : vector<2x128xf32> to vector<2x32xf32>
    %316 = arith.mulf %313, %299 : vector<2x32xf32>
    %317 = arith.mulf %312, %314 : vector<2x32xf32>
    %318 = arith.addf %316, %317 : vector<2x32xf32>
    %319 = math.tanh %318 : vector<2x32xf32>
    %320 = arith.mulf %315, %319 : vector<2x32xf32>
    %c14_75 = arith.constant 14 : index
    %c0_76 = arith.constant 0 : index
    %321 = vector.load %arg11[%c14_75, %c0_76] : memref<16x32xf32, #tpu.memory_space<vmem>>, vector<2x32xf32>
    tpu.vector_store %arg11[%c14_75, %c0_76], %320 {strides = array<i32>} : memref<16x32xf32, #tpu.memory_space<vmem>>, vector<2x32xf32>,
    %322 = tpu.concatenate %159, %320 in 0 : vector<2x32xf32>, vector<2x32xf32> -> vector<4x32xf32>
    %c0_77 = arith.constant 0 : index
    %c0_78 = arith.constant 0 : index
    %323 = vector.load %arg7[%c0_77, %c0_78] : memref<32x3xf32, #tpu.memory_space<vmem>>, vector<32x3xf32>
    %cst_79 = arith.constant dense<0.000000e+00> : vector<4x3xf32>
    %324 = tpu.matmul %322, %323, %cst_79 {dimension_numbers = #tpu.dot_dimension_numbers<[1], [0], [0], [1], [0, 0, 1, 1], [], []>} : vector<4x32xf32>, vector<32x3xf32>, vector<4x3xf32> -> vector<4x3xf32>
    %c0_80 = arith.constant 0 : index
    %c0_81 = arith.constant 0 : index
    %325 = vector.load %arg8[%c0_80, %c0_81] : memref<1x3xf32, #tpu.memory_space<vmem>>, vector<1x3xf32>
    %326 = vector.broadcast %325 : vector<1x3xf32> to vector<4x3xf32>
    %327 = arith.addf %324, %326 : vector<4x3xf32>
    %cst_82 = arith.constant dense<0xFF800000> : vector<4xf32>
    %328 = vector.multi_reduction <maximumf>, %327, %cst_82 [1] : vector<4x3xf32> to vector<4xf32>
    %329 = vector.shape_cast %328 : vector<4xf32> to vector<4x1xf32>
    %330 = vector.broadcast %329 : vector<4x1xf32> to vector<4x3xf32>
    %331 = arith.subf %327, %330 : vector<4x3xf32>
    %332 = math.exp %331 : vector<4x3xf32>
    %cst_83 = arith.constant dense<0.000000e+00> : vector<4xf32>
    %333 = vector.multi_reduction <add>, %332, %cst_83 [1] : vector<4x3xf32> to vector<4xf32>
    %334 = vector.shape_cast %333 : vector<4xf32> to vector<4x1xf32>
    %335 = vector.broadcast %334 : vector<4x1xf32> to vector<4x3xf32>
    %336 = arith.divf %332, %335 : vector<4x3xf32>
    %337 = vector.shape_cast %336 : vector<4x3xf32> to vector<2x2x3xf32>
    %c0_84 = arith.constant 0 : index
    %c0_85 = arith.constant 0 : index
    %c0_86 = arith.constant 0 : index
    %338 = vector.load %arg9[%c0_84, %c0_85, %c0_86] : memref<2x2x3xf32, #tpu.memory_space<vmem>>, vector<2x2x3xf32>
    tpu.vector_store %arg9[%c0_84, %c0_85, %c0_86], %337 {strides = array<i32>} : memref<2x2x3xf32, #tpu.memory_space<vmem>>, vector<2x2x3xf32>,
    return
  }
}

</mosaic_0001>

<bundles_post_ra>
// kernel: posdlxmert_forward.1
= control target key start
LH: loop header
LB: loop body
LE: loop exit
PB: predicated region body
PF: predicated region fallthrough
CT: control target
= control target key end

     0   :  { %14 = vsyncpa [#allocation5], 0  ;;  %s3161_s0 = inlined_call_operand.vmem [shape: f32[16,32], index: 0, kind: input, shape index: {}]   ;;  %s3162_s1 = inlined_call_operand.vmem [shape: f32[32,128], index: 1, kind: input, shape index: {}]   ;;  %s3163_s2 = inlined_call_operand.vmem [shape: f32[32,128], index: 2, kind: input, shape index: {}]   ;;  %s3164_s3 = inlined_call_operand.vmem [shape: f32[1,128], index: 3, kind: input, shape index: {}]   ;;  %s3165_s4 = inlined_call_operand.hbm [shape: f32[32,128], index: 4, kind: input, shape index: {}]   ;;  %s3166_s5 = inlined_call_operand.hbm [shape: f32[32,128], index: 5, kind: input, shape index: {}]   ;;  %s3167_s6 = inlined_call_operand.vmem [shape: f32[1,128], index: 6, kind: input, shape index: {}]   ;;  %s3168_s7 = inlined_call_operand.vmem [shape: f32[32,3], index: 7, kind: input, shape index: {}]   ;;  %s3169_s8 = inlined_call_operand.vmem [shape: f32[1,3], index: 8, kind: input, shape index: {}]   ;;  %s3170_s9 = inlined_call_operand.hbm [shape: f32[2,2,3], index: 9, kind: output, shape index: {}]  }
   0x1   :  { %15 = vsyncpa [#allocation8], 0 }
   0x2   :  { %16 = vsyncpa [#allocation6], 0  ;;  %s2690_s30 = smov [#allocation4]  }
   0x3   :  { %s30_s10 = sshll.u32 %s2690_s30, 4  ;;  %s31_s10 = int_to_ptr.vmem [resolvable:$true] %s30_s10 }
   0x4   :  { %s2632_s11 = scalar_lea.vmem %s31_s10, 512  ;;  %p2637_p1 = scmp.lt.s32.totalorder %s31_s10, %s31_s10 }
   0x5   :  { %p2633_p0 = scmp.ne.s32.totalorder %s31_s10, %s2632_s11  ;;  %p2638_p2 = scmp.lt.s32.totalorder %s2632_s11, %s2632_s11 }
   0x7   :  { %p2639_p3 = por %p2638_p2, %p2637_p1 }
   0x9   :  { %p2640_p4 = pnand %p2639_p3, %p2633_p0 }
   0xb   :  { %2643 = shalt.err (!%p2640_p4)
}
   0xc   :  { %s2691_s12 = smov 128   ;;  %s2692_s13 = smov 8  }
   0xd   :  { %36 = dma.hbm_to_vmem [thread:$0]  %s3165_s4, 512, %s31_s10, [#allocation5], %s2691_s12, %s2691_s12, %s2692_s13  }
   0xe   :  { %s2693_s16 = smov [#allocation7]  }
   0xf   :  { %s42_s17 = sshll.u32 %s2693_s16, 4  ;;  %s43_s17 = int_to_ptr.vmem [resolvable:$true] %s42_s17 }
  0x10   :  { %s2652_s18 = scalar_lea.vmem %s43_s17, 512  ;;  %p2657_p6 = scmp.lt.s32.totalorder %s43_s17, %s43_s17 }
  0x11   :  { %p2653_p5 = scmp.ne.s32.totalorder %s43_s17, %s2652_s18  ;;  %p2658_p7 = scmp.lt.s32.totalorder %s2652_s18, %s2652_s18 }
  0x13   :  { %p2659_p8 = por %p2658_p7, %p2657_p6 }
  0x15   :  { %p2660_p9 = pnand %p2659_p8, %p2653_p5 }
  0x17   :  { %2663 = shalt.err (!%p2660_p9)
}
  0x18   :  { %48 = dma.hbm_to_vmem [thread:$0]  %s3166_s5, 512, %s43_s17, [#allocation8], %s2691_s12, %s2691_s12, %s2692_s13  }
  0x19   :  { %2684 = dma.done.wait [#allocation5], 512  }
  0x1a   :  { %2685 = vsyncadd [#allocation5], 4294966784 }
  0x1b   :  { %2686 = dma.done.wait [#allocation8], 512  }
  0x1c   :  { %2687 = vsyncadd [#allocation8], 4294966784  ;;  %v2694_v0 = vmov 0.0   ;;  %vm2695_vm0 = vmmov 0   ;;  %v66_v1 = vld [vmem:[%s3162_s1 + $0x18] sm:$0xff]  ;;  %v65_v2 = vld [vmem:[%s3162_s1 + $0x10] sm:$0xff] }
  0x1d   :  { %2283 = vmatprep.subr.mxu1 %v2694_v0  ;;  %2291 = vmatprep.mubr.msk.f32.mxu1 %vm2695_vm0, %v2694_v0  ;;  %v2769_v3 = vld [vmem:[%s3163_s2 + $0x18] sm:$0xff]  ;;  %v2775_v4 = vld [vmem:[%s3163_s2 + $0x10] sm:$0xff]  ;;  %v64_v5 = vld [vmem:[%s3162_s1 + $0x8] sm:$0xff]  ;;  %vm78_vm1 = vcmask 261120   ;;  %vm262_vm2 = vcmask 254976   ;;  %vm371_vm3 = vcmask 257026  }
  0x1e   :  { %2272 = vmatprep.subr.mxu0 %v66_v1  ;;  %2284 = vmatpush3.msra.mxu1 %v2769_v3  ;;  %v61_v6 = vld [vmem:[%s3161_s0] sm:$0xff]  ;;  %v2788_v7 = vld [vmem:[%s3163_s2 + $0x8] sm:$0xff]  ;;  %vm595_vm4 = vcmask 261126   ;;  %vm483_vm5 = vcmask 259076   ;;  %vm2005_vm6 = vcmask 1041408   ;;  %vm2093_vm7 = vcmask 19456  }
  0x1f   :  { %2273 = vmatpush3.msra.mxu0 %v66_v1  ;;  %2285 = vmatprep.subr.mxu1 %v2694_v0  ;;  %v63_v8 = vld [vmem:[%s3162_s1] sm:$0xff]  ;;  %v62_v10 = vld [vmem:[%s3161_s0 + $0x8] sm:$0xff]  ;;  %vm2116_vm8 = vcmask 17408  }
  0x20   :  { %2274 = vmatprep.subr.mxu0 %v65_v2  ;;  %2286 = vmatpush3.msra.mxu1 %v2775_v4  ;;  %v2798_v9 = vld [vmem:[%s3163_s2] sm:$0xff]  ;;  %s2696_s2 = smov 64  }
  0x21   :  { %2275 = vmatpush3.msra.mxu0 %v65_v2  ;;  %2287 = vmatprep.subr.mxu1 %v2694_v0  ;;  %v2137_v11 = vld [vmem:[%s3164_s3] ss:$0 sm:$0xff]  ;;  %s2697_s3 = smov 32  }
  0x22   :  { %2276 = vmatprep.subr.mxu0 %v64_v5  ;;  %2280 = vmatprep.mubr.msk.f32.mxu0 %vm78_vm1, %v61_v6 }
  0x23   :  { %2277 = vmatpush3.msra.mxu0 %v64_v5  ;;  %2288 = vmatpush3.msra.mxu1 %v2788_v7 }
  0x24   :  { %2278 = vmatprep.subr.mxu0 %v63_v8  ;;  %2289 = vmatprep.subr.mxu1 %v2694_v0 }
  0x25   :  { %2279 = vmatpush3.msra.mxu0 %v63_v8  ;;  %2290 = vmatpush3.msra.mxu1 %v2798_v9 }
  0x26   :  { %2281 = vmatmul.mubr.msk.f32.vlgmr.msra.gmra.mxu0 %vm78_vm1, %v62_v10  ;;  %2292 = vmatmul.mubr.f32.vlgmr.msra.gmra.mxu1 %v2694_v0 }
  0x27   :  { %2294 = vmatprep.subr.mxu0 %v2694_v0  ;;  %2302 = vmatprep.mubr.msk.f32.mxu0 %vm2695_vm0, %v2694_v0 }
  0x28   :  { %2295 = vmatpush3.msra.mxu0 %v2769_v3  ;;  %2305 = vmatprep.subr.mxu1 %v2694_v0 }
  0x29   :  { %2296 = vmatprep.subr.mxu0 %v2694_v0  ;;  %2306 = vmatpush3.msra.mxu1 %v2769_v3 }
  0x2a   :  { %2297 = vmatpush3.msra.mxu0 %v2775_v4  ;;  %2307 = vmatprep.subr.mxu1 %v2694_v0 }
  0x2b   :  { %2298 = vmatprep.subr.mxu0 %v2694_v0  ;;  %2308 = vmatpush3.msra.mxu1 %v2775_v4 }
  0x2c   :  { %2299 = vmatpush3.msra.mxu0 %v2788_v7  ;;  %2309 = vmatprep.subr.mxu1 %v2694_v0 }
  0x2d   :  { %2300 = vmatprep.subr.mxu0 %v2694_v0  ;;  %2310 = vmatpush3.msra.mxu1 %v2788_v7 }
  0x2e   :  { %2301 = vmatpush3.msra.mxu0 %v2798_v9  ;;  %2311 = vmatprep.subr.mxu1 %v2694_v0 }
  0x2f   :  { %2312 = vmatpush3.msra.mxu1 %v2798_v9  ;;  %2313 = vmatprep.mubr.msk.f32.mxu1 %vm2695_vm0, %v2694_v0 }
  0x30   :  { %2316 = vmatprep.subr.mxu0 %v2694_v0  ;;  %2327 = vmatprep.subr.mxu1 %v2694_v0 }
  0xe6   :  { %v2282_v12 = vpop.f32.mrf.mxu0  ;;  %v229_v13 = vpop.f32.mrf.mxu1 }
  0xe7   :  { %v2833_v14 = vadd.f32 %v2282_v12, %v2137_v11 }
  0xe8   :  { %v151_v15 = vpop.f32.mrf.mxu0  ;;  %v2293_v16 = vpop.f32.mrf.mxu1 }
  0xe9   :  { %v2835_v17 = vadd.f32 %v2137_v11, %v151_v15 }
  0xeb   :  { %v233_v18 = vadd.f32 %v229_v13, %v2835_v17 }
  0xed   :  { %2492 = vtanh.f32 %v233_v18  ;;  %v2140_v20 = vmul.f32 -1.442695, %v233_v18 }
  0xef   :  { %2494 = vpow2.f32 %v2140_v20 }
  0xfa   :  { %v2493_v19 = vpop.eup %2492 }
  0xfb   :  { %243 = vrot.lane.b32.xlu0 %v2493_v19, %s2696_s2 }
  0xfc   :  { %v2495_v21 = vpop.eup %2494 }
  0xfd   :  { %v237_v22 = vadd.f32 1.0, %v2495_v21 }
  0xff   :  { %2496 = vrcp.f32 %v237_v22 }
 0x10c   :  { %v2497_v23 = vpop.eup %2496 }
 0x10d   :  { %v241_v26 = vmul.f32 0.0, %v2497_v23 }
 0x16d   :  { %v244_v24 = vpop.permute.xlu0 %243 }
 0x16e   :  { %v246_v25 = vmul.f32 %v2497_v23, %v244_v24 }
 0x170   :  { %248 = vrot.lane.b32.xlu0 %v246_v25, %s2697_s3 }
 0x1e2   :  { %v249_v27 = vpop.permute.xlu0 %248 }
 0x1e3   :  { %v251_v28 = vadd.f32 %v249_v27, %v241_v26 }
 0x1e5   :  { %2498 = vtanh.f32 %v251_v28  ;;  %v348_v44 = vrot.slane %v251_v28, 6 }
 0x1f2   :  { %v2499_v29 = vpop.eup %2498 }
 0x1f3   :  { %254 = vrot.lane.b32.xlu1 %v2499_v29, %s2696_s2 }
 0x265   :  { %v255_v30 = vpop.permute.xlu1 %254 }
 0x266   :  { %v257_v31 = vmul.f32 %v2497_v23, %v255_v30 }
 0x268   :  { %259 = vrot.lane.b32.xlu1 %v257_v31, %s2697_s3 }
 0x2da   :  { %v260_v32 = vpop.permute.xlu1 %259 }
 0x2db   :  { %263 = vst.msk [vmem:[#allocation2] sm:$0x3] %vm262_vm2, %v260_v32  ;;  %2303 = vmatmul.mubr.msk.f32.vlgmr.msra.gmra.mxu0 %vm78_vm1, %v260_v32 }
 0x2dc   :  { %2317 = vmatpush3.msra.mxu0 %v2769_v3  ;;  %2324 = vmatprep.mubr.msk.f32.mxu0 %vm2695_vm0, %v2694_v0 }
 0x2dd   :  { %2318 = vmatprep.subr.mxu0 %v2694_v0 }
 0x2de   :  { %2319 = vmatpush3.msra.mxu0 %v2775_v4 }
 0x2df   :  { %2320 = vmatprep.subr.mxu0 %v2694_v0 }
 0x2e0   :  { %2321 = vmatpush3.msra.mxu0 %v2788_v7 }
 0x2e1   :  { %2322 = vmatprep.subr.mxu0 %v2694_v0 }
 0x2e2   :  { %2323 = vmatpush3.msra.mxu0 %v2798_v9 }
 0x2e3   :  { %2338 = vmatprep.subr.mxu0 %v2694_v0 }
 0x39b   :  { %v332_v33 = vpop.f32.mrf.mxu0 }
 0x39c   :  { %v337_v34 = vrot.slane %v332_v33, 6 }
 0x39d   :  { %v2304_v35 = vpop.f32.mrf.mxu0 }
 0x39e   :  { %v339_v36 = vadd.f32 %v337_v34, %v2835_v17 }
 0x3a0   :  { %2500 = vtanh.f32 %v339_v36  ;;  %v2142_v38 = vmul.f32 -1.442695, %v339_v36 }
 0x3a2   :  { %2502 = vpow2.f32 %v2142_v38 }
 0x3ad   :  { %v2501_v37 = vpop.eup %2500 }
 0x3ae   :  { %352 = vrot.lane.b32.xlu0 %v2501_v37, %s2696_s2 }
 0x3af   :  { %v2503_v39 = vpop.eup %2502 }
 0x3b0   :  { %v343_v40 = vadd.f32 1.0, %v2503_v39 }
 0x3b2   :  { %2504 = vrcp.f32 %v343_v40 }
 0x3bf   :  { %v2505_v41 = vpop.eup %2504 }
 0x3c0   :  { %v350_v45 = vmul.f32 %v2505_v41, %v348_v44 }
 0x420   :  { %v353_v42 = vpop.permute.xlu0 %352 }
 0x421   :  { %v355_v43 = vmul.f32 %v2505_v41, %v353_v42 }
 0x423   :  { %357 = vrot.lane.b32.xlu1 %v355_v43, %s2697_s3 }
 0x495   :  { %v358_v46 = vpop.permute.xlu1 %357 }
 0x496   :  { %v360_v47 = vadd.f32 %v358_v46, %v350_v45 }
 0x498   :  { %2506 = vtanh.f32 %v360_v47  ;;  %v460_v1 = vrot.slane %v360_v47, 6 }
 0x4a5   :  { %v2507_v48 = vpop.eup %2506 }
 0x4a6   :  { %363 = vrot.lane.b32.xlu0 %v2507_v48, %s2696_s2 }
 0x518   :  { %v364_v49 = vpop.permute.xlu0 %363 }
 0x519   :  { %v2858_v50 = vmul.f32 %v2505_v41, %v364_v49 }
 0x51b   :  { %v373_v51 = vrot.slane %v2858_v50, 2 }
 0x51d   :  { %374 = vrot.lane.b32.xlu1 %v373_v51, %s2697_s3 }
 0x58f   :  { %v375_v52 = vpop.permute.xlu1 %374 }
 0x590   :  { %2314 = vmatmul.mubr.msk.f32.vlgmr.msra.gmra.mxu1 %vm78_vm1, %v375_v52 }
 0x591   :  { %2328 = vmatpush3.msra.mxu1 %v2769_v3  ;;  %2335 = vmatprep.mubr.msk.f32.mxu1 %vm2695_vm0, %v2694_v0 }
 0x592   :  { %2329 = vmatprep.subr.mxu1 %v2694_v0 }
 0x593   :  { %2330 = vmatpush3.msra.mxu1 %v2775_v4 }
 0x594   :  { %2331 = vmatprep.subr.mxu1 %v2694_v0 }
 0x595   :  { %2332 = vmatpush3.msra.mxu1 %v2788_v7 }
 0x596   :  { %2333 = vmatprep.subr.mxu1 %v2694_v0 }
 0x597   :  { %2334 = vmatpush3.msra.mxu1 %v2798_v9 }
 0x598   :  { %2349 = vmatprep.subr.mxu1 %v2694_v0 }
 0x650   :  { %v444_v53 = vpop.f32.mrf.mxu1 }
 0x651   :  { %v449_v54 = vrot.slane %v444_v53, 4 }
 0x652   :  { %v2315_v55 = vpop.f32.mrf.mxu1 }
 0x653   :  { %v451_v56 = vadd.f32 %v449_v54, %v2835_v17 }
 0x655   :  { %2508 = vtanh.f32 %v451_v56  ;;  %v2144_v58 = vmul.f32 -1.442695, %v451_v56 }
 0x657   :  { %2510 = vpow2.f32 %v2144_v58 }
 0x662   :  { %v2509_v57 = vpop.eup %2508 }
 0x663   :  { %464 = vrot.lane.b32.xlu0 %v2509_v57, %s2696_s2 }
 0x664   :  { %v2511_v59 = vpop.eup %2510 }
 0x665   :  { %v455_v60 = vadd.f32 1.0, %v2511_v59 }
 0x667   :  { %2512 = vrcp.f32 %v455_v60 }
 0x674   :  { %v2513_v61 = vpop.eup %2512 }
 0x675   :  { %v462_v2 = vmul.f32 %v2513_v61, %v460_v1 }
 0x6d5   :  { %v465_v62 = vpop.permute.xlu0 %464 }
 0x6d6   :  { %v467_v63 = vmul.f32 %v2513_v61, %v465_v62 }
 0x6d8   :  { %469 = vrot.lane.b32.xlu1 %v467_v63, %s2697_s3 }
 0x74a   :  { %v470_v5 = vpop.permute.xlu1 %469 }
 0x74b   :  { %v472_v6 = vadd.f32 %v470_v5, %v462_v2 }
 0x74d   :  { %2514 = vtanh.f32 %v472_v6  ;;  %v572_v27 = vrot.slane %v472_v6, 6 }
 0x75a   :  { %v2515_v8 = vpop.eup %2514 }
 0x75b   :  { %475 = vrot.lane.b32.xlu0 %v2515_v8, %s2696_s2 }
 0x7cd   :  { %v476_v10 = vpop.permute.xlu0 %475 }
 0x7ce   :  { %v2877_v11 = vmul.f32 %v2513_v61, %v476_v10 }
 0x7d0   :  { %v485_v12 = vrot.slane %v2877_v11, 4 }
 0x7d2   :  { %486 = vrot.lane.b32.xlu1 %v485_v12, %s2697_s3 }
 0x844   :  { %v487_v13 = vpop.permute.xlu1 %486 }
 0x845   :  { %2325 = vmatmul.mubr.msk.f32.vlgmr.msra.gmra.mxu0 %vm78_vm1, %v487_v13 }
 0x846   :  { %2339 = vmatpush3.msra.mxu0 %v2769_v3  ;;  %2346 = vmatprep.mubr.msk.f32.mxu0 %vm2695_vm0, %v2694_v0 }
 0x847   :  { %2340 = vmatprep.subr.mxu0 %v2694_v0 }
 0x848   :  { %2341 = vmatpush3.msra.mxu0 %v2775_v4 }
 0x849   :  { %2342 = vmatprep.subr.mxu0 %v2694_v0 }
 0x84a   :  { %2343 = vmatpush3.msra.mxu0 %v2788_v7 }
 0x84b   :  { %2344 = vmatprep.subr.mxu0 %v2694_v0 }
 0x84c   :  { %2345 = vmatpush3.msra.mxu0 %v2798_v9 }
 0x84d   :  { %2360 = vmatprep.subr.mxu0 %v2694_v0 }
 0x905   :  { %v556_v15 = vpop.f32.mrf.mxu0 }
 0x906   :  { %v561_v16 = vrot.slane %v556_v15, 2 }
 0x907   :  { %v2326_v18 = vpop.f32.mrf.mxu0 }
 0x908   :  { %v563_v19 = vadd.f32 %v561_v16, %v2835_v17 }
 0x90a   :  { %2516 = vtanh.f32 %v563_v19  ;;  %v2146_v21 = vmul.f32 -1.442695, %v563_v19 }
 0x90c   :  { %2518 = vpow2.f32 %v2146_v21 }
 0x917   :  { %v2517_v20 = vpop.eup %2516 }
 0x918   :  { %576 = vrot.lane.b32.xlu0 %v2517_v20, %s2696_s2 }
 0x919   :  { %v2519_v22 = vpop.eup %2518 }
 0x91a   :  { %v567_v23 = vadd.f32 1.0, %v2519_v22 }
 0x91c   :  { %2520 = vrcp.f32 %v567_v23 }
 0x929   :  { %v2521_v24 = vpop.eup %2520 }
 0x92a   :  { %v574_v28 = vmul.f32 %v2521_v24, %v572_v27 }
 0x98a   :  { %v577_v25 = vpop.permute.xlu0 %576 }
 0x98b   :  { %v579_v26 = vmul.f32 %v2521_v24, %v577_v25 }
 0x98d   :  { %581 = vrot.lane.b32.xlu1 %v579_v26, %s2697_s3 }
 0x9ff   :  { %v582_v29 = vpop.permute.xlu1 %581 }
 0xa00   :  { %v584_v30 = vadd.f32 %v582_v29, %v574_v28 }
 0xa02   :  { %2522 = vtanh.f32 %v584_v30  ;;  %v681_v45 = vrot.slane %v584_v30, 6 }
 0xa0f   :  { %v2523_v17 = vpop.eup %2522 }
 0xa10   :  { %587 = vrot.lane.b32.xlu0 %v2523_v17, %s2696_s2 }
 0xa82   :  { %v588_v31 = vpop.permute.xlu0 %587 }
 0xa83   :  { %v2896_v32 = vmul.f32 %v2521_v24, %v588_v31 }
 0xa85   :  { %v597_v33 = vrot.slane %v2896_v32, 6 }
 0xa87   :  { %598 = vrot.lane.b32.xlu1 %v597_v33, %s2697_s3 }
 0xaf9   :  { %v599_v34 = vpop.permute.xlu1 %598 }
 0xafa   :  { %2336 = vmatmul.mubr.msk.f32.vlgmr.msra.gmra.mxu1 %vm78_vm1, %v599_v34 }
 0xafb   :  { %2350 = vmatpush3.msra.mxu1 %v2769_v3  ;;  %2357 = vmatprep.mubr.msk.f32.mxu1 %vm2695_vm0, %v2694_v0 }
 0xafc   :  { %2351 = vmatprep.subr.mxu1 %v2694_v0 }
 0xafd   :  { %2352 = vmatpush3.msra.mxu1 %v2775_v4 }
 0xafe   :  { %2353 = vmatprep.subr.mxu1 %v2694_v0 }
 0xaff   :  { %2354 = vmatpush3.msra.mxu1 %v2788_v7 }
 0xb00   :  { %2355 = vmatprep.subr.mxu1 %v2694_v0 }
 0xb01   :  { %2356 = vmatpush3.msra.mxu1 %v2798_v9 }
 0xbba   :  { %v668_v35 = vpop.f32.mrf.mxu1 }
 0xbbb   :  { %v672_v36 = vadd.f32 %v668_v35, %v2833_v14 }
 0xbbc   :  { %v2337_v37 = vpop.f32.mrf.mxu1 }
 0xbbd   :  { %2524 = vtanh.f32 %v672_v36  ;;  %v2148_v39 = vmul.f32 -1.442695, %v672_v36 }
 0xbbf   :  { %2526 = vpow2.f32 %v2148_v39 }
 0xbca   :  { %v2525_v38 = vpop.eup %2524 }
 0xbcb   :  { %685 = vrot.lane.b32.xlu0 %v2525_v38, %s2696_s2 }
 0xbcc   :  { %v2527_v40 = vpop.eup %2526 }
 0xbcd   :  { %v676_v41 = vadd.f32 1.0, %v2527_v40 }
 0xbcf   :  { %2528 = vrcp.f32 %v676_v41 }
 0xbdc   :  { %v2529_v42 = vpop.eup %2528 }
 0xbdd   :  { %v683_v46 = vmul.f32 %v2529_v42, %v681_v45 }
 0xc3d   :  { %v686_v43 = vpop.permute.xlu0 %685 }
 0xc3e   :  { %v688_v44 = vmul.f32 %v2529_v42, %v686_v43 }
 0xc40   :  { %690 = vrot.lane.b32.xlu1 %v688_v44, %s2697_s3 }
 0xcb2   :  { %v691_v47 = vpop.permute.xlu1 %690 }
 0xcb3   :  { %v693_v48 = vadd.f32 %v691_v47, %v683_v46 }
 0xcb5   :  { %2530 = vtanh.f32 %v693_v48 }
 0xcc2   :  { %v2531_v49 = vpop.eup %2530 }
 0xcc3   :  { %696 = vrot.lane.b32.xlu0 %v2531_v49, %s2696_s2 }
 0xd35   :  { %v697_v51 = vpop.permute.xlu0 %696 }
 0xd36   :  { %v699_v52 = vmul.f32 %v2529_v42, %v697_v51  ;;  %v1040_v51 = vld [vmem:[#allocation4 + $0x18] sm:$0xff] }
 0xd37   :  { %2371 = vmatprep.subr.mxu1 %v1040_v51 }
 0xd38   :  { %701 = vrot.lane.b32.xlu1 %v699_v52, %s2697_s3  ;;  %v1039_v52 = vld [vmem:[#allocation4 + $0x10] sm:$0xff] }
 0xdaa   :  { %v702_v53 = vpop.permute.xlu1 %701 }
 0xdab   :  { %704 = vst.msk [vmem:[#allocation2 + $0x8] sm:$0x3] %vm262_vm2, %v702_v53  ;;  %2347 = vmatmul.mubr.msk.f32.vlgmr.msra.gmra.mxu0 %vm78_vm1, %v702_v53  ;;  %v2960_v53 = vld [vmem:[#allocation7 + $0x18] sm:$0xff] }
 0xdac   :  { %2361 = vmatpush3.msra.mxu0 %v2769_v3  ;;  %2368 = vmatprep.mubr.msk.f32.mxu0 %vm2695_vm0, %v2694_v0 }
 0xdad   :  { %2362 = vmatprep.subr.mxu0 %v2694_v0 }
 0xdae   :  { %2363 = vmatpush3.msra.mxu0 %v2775_v4 }
 0xdaf   :  { %2364 = vmatprep.subr.mxu0 %v2694_v0 }
 0xdb0   :  { %2365 = vmatpush3.msra.mxu0 %v2788_v7 }
 0xdb1   :  { %2366 = vmatprep.subr.mxu0 %v2694_v0 }
 0xdb2   :  { %2367 = vmatpush3.msra.mxu0 %v2798_v9  ;;  %v789_v9 = vrot.slane %v693_v48, 6 }
 0xdb3   :  { %2382 = vmatprep.subr.mxu0 %v2694_v0 }
 0xe6b   :  { %v773_v54 = vpop.f32.mrf.mxu0 }
 0xe6c   :  { %v778_v55 = vrot.slane %v773_v54, 6  ;;  %v1038_v54 = vld [vmem:[#allocation4 + $0x8] sm:$0xff] }
 0xe6d   :  { %v2348_v3 = vpop.f32.mrf.mxu0 }
 0xe6e   :  { %v780_v56 = vadd.f32 %v778_v55, %v2833_v14  ;;  %v2963_v55 = vld [vmem:[#allocation7 + $0x10] sm:$0xff]  ;;  %v2966_v3 = vld [vmem:[#allocation7 + $0x8] sm:$0xff] }
 0xe70   :  { %2532 = vtanh.f32 %v780_v56  ;;  %v2150_v4 = vmul.f32 -1.442695, %v780_v56  ;;  %v2972_v56 = vld [vmem:[#allocation7] sm:$0xff] }
 0xe72   :  { %2534 = vpow2.f32 %v2150_v4 }
 0xe7d   :  { %v2533_v57 = vpop.eup %2532 }
 0xe7e   :  { %793 = vrot.lane.b32.xlu0 %v2533_v57, %s2696_s2 }
 0xe7f   :  { %v2535_v58 = vpop.eup %2534 }
 0xe80   :  { %v784_v59 = vadd.f32 1.0, %v2535_v58 }
 0xe82   :  { %2536 = vrcp.f32 %v784_v59 }
 0xe8f   :  { %v2537_v7 = vpop.eup %2536 }
 0xe90   :  { %v791_v62 = vmul.f32 %v2537_v7, %v789_v9 }
 0xef0   :  { %v794_v60 = vpop.permute.xlu0 %793 }
 0xef1   :  { %v796_v61 = vmul.f32 %v2537_v7, %v794_v60 }
 0xef3   :  { %798 = vrot.lane.b32.xlu1 %v796_v61, %s2697_s3 }
 0xf65   :  { %v799_v63 = vpop.permute.xlu1 %798 }
 0xf66   :  { %v801_v1 = vadd.f32 %v799_v63, %v791_v62  ;;  %v2155_v63 = vld [vmem:[%s3167_s6] ss:$0 sm:$0xff] }
 0xf68   :  { %2538 = vtanh.f32 %v801_v1  ;;  %v900_v25 = vrot.slane %v801_v1, 6 }
 0xf75   :  { %v2539_v2 = vpop.eup %2538 }
 0xf76   :  { %804 = vrot.lane.b32.xlu0 %v2539_v2, %s2696_s2 }
 0xfe8   :  { %v805_v5 = vpop.permute.xlu0 %804 }
 0xfe9   :  { %v2931_v6 = vmul.f32 %v2537_v7, %v805_v5 }
 0xfeb   :  { %v813_v8 = vrot.slane %v2931_v6, 2 }
 0xfed   :  { %814 = vrot.lane.b32.xlu1 %v813_v8, %s2697_s3 }
0x105f   :  { %v815_v10 = vpop.permute.xlu1 %814 }
0x1060   :  { %2358 = vmatmul.mubr.msk.f32.vlgmr.msra.gmra.mxu1 %vm78_vm1, %v815_v10 }
0x1061   :  { %2372 = vmatpush3.msra.mxu1 %v1040_v51 }
0x1062   :  { %2373 = vmatprep.subr.mxu1 %v1039_v52 }
0x1063   :  { %2374 = vmatpush3.msra.mxu1 %v1039_v52 }
0x1064   :  { %2375 = vmatprep.subr.mxu1 %v1038_v54 }
0x1065   :  { %2376 = vmatpush3.msra.mxu1 %v1038_v54 }
0x1120   :  { %v884_v12 = vpop.f32.mrf.mxu1 }
0x1121   :  { %v889_v13 = vrot.slane %v884_v12, 4 }
0x1122   :  { %v2359_v15 = vpop.f32.mrf.mxu1 }
0x1123   :  { %v891_v16 = vadd.f32 %v889_v13, %v2833_v14 }
0x1125   :  { %2540 = vtanh.f32 %v891_v16  ;;  %v2152_v19 = vmul.f32 -1.442695, %v891_v16 }
0x1127   :  { %2542 = vpow2.f32 %v2152_v19 }
0x1132   :  { %v2541_v18 = vpop.eup %2540 }
0x1133   :  { %904 = vrot.lane.b32.xlu0 %v2541_v18, %s2696_s2 }
0x1134   :  { %v2543_v20 = vpop.eup %2542 }
0x1135   :  { %v895_v21 = vadd.f32 1.0, %v2543_v20 }
0x1137   :  { %2544 = vrcp.f32 %v895_v21 }
0x1144   :  { %v2545_v22 = vpop.eup %2544 }
0x1145   :  { %v902_v26 = vmul.f32 %v2545_v22, %v900_v25 }
0x11a5   :  { %v905_v23 = vpop.permute.xlu0 %904 }
0x11a6   :  { %v907_v24 = vmul.f32 %v2545_v22, %v905_v23 }
0x11a8   :  { %909 = vrot.lane.b32.xlu1 %v907_v24, %s2697_s3 }
0x121a   :  { %v910_v27 = vpop.permute.xlu1 %909 }
0x121b   :  { %v912_v28 = vadd.f32 %v910_v27, %v902_v26 }
0x121d   :  { %2546 = vtanh.f32 %v912_v28 }
0x122a   :  { %v2547_v29 = vpop.eup %2546 }
0x122b   :  { %915 = vrot.lane.b32.xlu0 %v2547_v29, %s2696_s2 }
0x129d   :  { %v916_v30 = vpop.permute.xlu0 %915 }
0x129e   :  { %v918_v17 = vmul.f32 %v2545_v22, %v916_v30 }
0x12a0   :  { %v924_v31 = vrot.slane %v918_v17, 4 }
0x12a2   :  { %925 = vrot.lane.b32.xlu1 %v924_v31, %s2697_s3 }
0x1314   :  { %v926_v33 = vpop.permute.xlu1 %925 }
0x1315   :  { %2369 = vmatmul.mubr.msk.f32.vlgmr.msra.gmra.mxu0 %vm78_vm1, %v926_v33 }
0x1316   :  { %2390 = vmatprep.mubr.msk.f32.mxu0 %vm2695_vm0, %v2694_v0  ;;  %2383 = vmatpush3.msra.mxu0 %v2960_v53 }
0x1317   :  { %2384 = vmatprep.subr.mxu0 %v2694_v0 }
0x1318   :  { %2385 = vmatpush3.msra.mxu0 %v2963_v55 }
0x1319   :  { %2386 = vmatprep.subr.mxu0 %v2694_v0 }
0x131a   :  { %2387 = vmatpush3.msra.mxu0 %v2966_v3 }
0x131b   :  { %2388 = vmatprep.subr.mxu0 %v2694_v0 }
0x131c   :  { %2389 = vmatpush3.msra.mxu0 %v2972_v56 }
0x131d   :  { %2391 = vmatmul.mubr.f32.vlgmr.msra.gmra.mxu0 %v2694_v0  ;;  %2404 = vmatprep.subr.mxu0 %v2694_v0 }
0x131e   :  { %2405 = vmatpush3.msra.mxu0 %v2960_v53  ;;  %2412 = vmatprep.mubr.msk.f32.mxu0 %vm2695_vm0, %v2694_v0 }
0x131f   :  { %2406 = vmatprep.subr.mxu0 %v2694_v0 }
0x1320   :  { %2407 = vmatpush3.msra.mxu0 %v2963_v55 }
0x1321   :  { %2408 = vmatprep.subr.mxu0 %v2694_v0 }
0x1322   :  { %2409 = vmatpush3.msra.mxu0 %v2966_v3 }
0x1323   :  { %2410 = vmatprep.subr.mxu0 %v2694_v0 }
0x1324   :  { %2411 = vmatpush3.msra.mxu0 %v2972_v56 }
0x1325   :  { %2426 = vmatprep.subr.mxu0 %v2694_v0 }
0x13d5   :  { %v995_v34 = vpop.f32.mrf.mxu0 }
0x13d6   :  { %v1000_v35 = vrot.slane %v995_v34, 2 }
0x13d7   :  { %v2370_v36 = vpop.f32.mrf.mxu0 }
0x13d8   :  { %v1002_v37 = vadd.f32 %v1000_v35, %v2833_v14  ;;  %v1011_v14 = vrot.slane %v912_v28, 6 }
0x13da   :  { %2548 = vtanh.f32 %v1002_v37  ;;  %v2154_v39 = vmul.f32 -1.442695, %v1002_v37 }
0x13dc   :  { %2550 = vpow2.f32 %v2154_v39 }
0x13dd   :  { %v1199_v9 = vpop.f32.mrf.mxu0 }
0x13df   :  { %v2392_v62 = vpop.f32.mrf.mxu0 }
0x13e7   :  { %v2549_v38 = vpop.eup %2548 }
0x13e8   :  { %1015 = vrot.lane.b32.xlu0 %v2549_v38, %s2696_s2 }
0x13e9   :  { %v2551_v40 = vpop.eup %2550 }
0x13ea   :  { %v1006_v41 = vadd.f32 1.0, %v2551_v40 }
0x13ec   :  { %2552 = vrcp.f32 %v1006_v41 }
0x13f9   :  { %v2553_v42 = vpop.eup %2552 }
0x13fa   :  { %v1013_v45 = vmul.f32 %v2553_v42, %v1011_v14 }
0x145a   :  { %v1016_v43 = vpop.permute.xlu0 %1015 }
0x145b   :  { %v1018_v44 = vmul.f32 %v2553_v42, %v1016_v43 }
0x145d   :  { %1020 = vrot.lane.b32.xlu1 %v1018_v44, %s2697_s3 }
0x1461   :  { %368 = vrot.lane.b32.xlu1 %v2858_v50, %s2697_s3 }
0x1465   :  { %592 = vrot.lane.b32.xlu1 %v2896_v32, %s2697_s3 }
0x1469   :  { %920 = vrot.lane.b32.xlu1 %v918_v17, %s2697_s3 }
0x14cf   :  { %v1021_v46 = vpop.permute.xlu1 %1020 }
0x14d0   :  { %v1023_v47 = vadd.f32 %v1021_v46, %v1013_v45 }
0x14d2   :  { %2554 = vtanh.f32 %v1023_v47 }
0x14d3   :  { %v369_v48 = vpop.permute.xlu1 %368 }
0x14d4   :  { %372 = vst.msk [vmem:[#allocation2] sm:$0xc] %vm371_vm3, %v369_v48 }
0x14d7   :  { %v593_v49 = vpop.permute.xlu1 %592 }
0x14d8   :  { %596 = vst.msk [vmem:[#allocation2] sm:$0xc0] %vm595_vm4, %v593_v49 }
0x14db   :  { %v921_v50 = vpop.permute.xlu1 %920 }
0x14dc   :  { %923 = vst.msk [vmem:[#allocation2 + $0x8] sm:$0x30] %vm483_vm5, %v921_v50 }
0x14df   :  { %v2555_v32 = vpop.eup %2554 }
0x14e0   :  { %1026 = vrot.lane.b32.xlu0 %v2555_v32, %s2696_s2 }
0x14e4   :  { %480 = vrot.lane.b32.xlu0 %v2877_v11, %s2697_s3  ;;  %v1037_v11 = vld [vmem:[#allocation4] sm:$0xff] }
0x14e5   :  { %2377 = vmatprep.subr.mxu1 %v1037_v11 }
0x14e6   :  { %2378 = vmatpush3.msra.mxu1 %v1037_v11 }
0x14e7   :  { %2393 = vmatprep.subr.mxu1 %v2694_v0 }
0x14e8   :  { %809 = vrot.lane.b32.xlu0 %v2931_v6, %s2697_s3 }
0x1552   :  { %v1027_v57 = vpop.permute.xlu0 %1026 }
0x1553   :  { %v2978_v4 = vmul.f32 %v2553_v42, %v1027_v57 }
0x1555   :  { %1031 = vrot.lane.b32.xlu0 %v2978_v4, %s2697_s3 }
0x1556   :  { %v481_v58 = vpop.permute.xlu0 %480 }
0x1557   :  { %484 = vst.msk [vmem:[#allocation2] sm:$0x30] %vm483_vm5, %v481_v58 }
0x155a   :  { %v810_v59 = vpop.permute.xlu0 %809 }
0x155b   :  { %812 = vst.msk [vmem:[#allocation2 + $0x8] sm:$0xc] %vm371_vm3, %v810_v59 }
0x155e   :  { %v1035_v7 = vld [vmem:[#allocation2] sm:$0xff] }
0x155f   :  { %2379 = vmatprep.mubr.msk.f32.mxu1 %vm78_vm1, %v1035_v7 }
0x15c7   :  { %v1032_v60 = vpop.permute.xlu0 %1031 }
0x15c8   :  { %1034 = vst.msk [vmem:[#allocation2 + $0x8] sm:$0xc0] %vm595_vm4, %v1032_v60 }
0x15cf   :  { %v1036_v61 = vld [vmem:[#allocation2 + $0x8] sm:$0xff] }
0x15d0   :  { %2380 = vmatmul.mubr.msk.f32.vlgmr.msra.gmra.mxu1 %vm78_vm1, %v1036_v61 }
0x15d1   :  { %2394 = vmatpush3.msra.mxu1 %v2960_v53  ;;  %2401 = vmatprep.mubr.msk.f32.mxu1 %vm2695_vm0, %v2694_v0 }
0x15d2   :  { %2395 = vmatprep.subr.mxu1 %v2694_v0 }
0x15d3   :  { %2396 = vmatpush3.msra.mxu1 %v2963_v55 }
0x15d4   :  { %2397 = vmatprep.subr.mxu1 %v2694_v0 }
0x15d5   :  { %2398 = vmatpush3.msra.mxu1 %v2966_v3 }
0x15d6   :  { %2399 = vmatprep.subr.mxu1 %v2694_v0 }
0x15d7   :  { %2400 = vmatpush3.msra.mxu1 %v2972_v56 }
0x15d8   :  { %2415 = vmatprep.subr.mxu1 %v2694_v0 }
0x1690   :  { %v2381_v1 = vpop.f32.mrf.mxu1 }
0x1691   :  { %v3010_v2 = vadd.f32 %v2381_v1, %v2155_v63 }
0x1692   :  { %v1124_v5 = vpop.f32.mrf.mxu1 }
0x1693   :  { %v3012_v6 = vadd.f32 %v2155_v63, %v1124_v5 }
0x1695   :  { %v1203_v8 = vadd.f32 %v1199_v9, %v3012_v6 }
0x1697   :  { %2556 = vtanh.f32 %v1203_v8  ;;  %v2158_v12 = vmul.f32 -1.442695, %v1203_v8 }
0x1699   :  { %2558 = vpow2.f32 %v2158_v12 }
0x16a4   :  { %v2557_v10 = vpop.eup %2556 }
0x16a5   :  { %1213 = vrot.lane.b32.xlu1 %v2557_v10, %s2696_s2 }
0x16a6   :  { %v2559_v13 = vpop.eup %2558 }
0x16a7   :  { %v1207_v15 = vadd.f32 1.0, %v2559_v13 }
0x16a9   :  { %2560 = vrcp.f32 %v1207_v15 }
0x16b6   :  { %v2561_v16 = vpop.eup %2560 }
0x16b7   :  { %v1211_v20 = vmul.f32 0.0, %v2561_v16 }
0x1717   :  { %v1214_v18 = vpop.permute.xlu1 %1213 }
0x1718   :  { %v1216_v19 = vmul.f32 %v2561_v16, %v1214_v18 }
0x171a   :  { %1218 = vrot.lane.b32.xlu0 %v1216_v19, %s2697_s3 }
0x178c   :  { %v1219_v21 = vpop.permute.xlu0 %1218 }
0x178d   :  { %v1221_v22 = vadd.f32 %v1219_v21, %v1211_v20 }
0x178f   :  { %2562 = vtanh.f32 %v1221_v22  ;;  %v1317_v38 = vrot.slane %v1221_v22, 6 }
0x179c   :  { %v2563_v23 = vpop.eup %2562 }
0x179d   :  { %1224 = vrot.lane.b32.xlu1 %v2563_v23, %s2696_s2 }
0x180f   :  { %v1225_v24 = vpop.permute.xlu1 %1224 }
0x1810   :  { %v1227_v25 = vmul.f32 %v2561_v16, %v1225_v24 }
0x1812   :  { %1229 = vrot.lane.b32.xlu0 %v1227_v25, %s2697_s3 }
0x1884   :  { %v1230_v26 = vpop.permute.xlu0 %1229 }
0x1885   :  { %2402 = vmatmul.mubr.msk.f32.vlgmr.msra.gmra.mxu1 %vm78_vm1, %v1230_v26 }
0x1886   :  { %2416 = vmatpush3.msra.mxu1 %v2960_v53  ;;  %2423 = vmatprep.mubr.msk.f32.mxu1 %vm2695_vm0, %v2694_v0 }
0x1887   :  { %2417 = vmatprep.subr.mxu1 %v2694_v0 }
0x1888   :  { %2418 = vmatpush3.msra.mxu1 %v2963_v55 }
0x1889   :  { %2419 = vmatprep.subr.mxu1 %v2694_v0 }
0x188a   :  { %2420 = vmatpush3.msra.mxu1 %v2966_v3 }
0x188b   :  { %2421 = vmatprep.subr.mxu1 %v2694_v0 }
0x188c   :  { %2422 = vmatpush3.msra.mxu1 %v2972_v56 }
0x188d   :  { %2437 = vmatprep.subr.mxu1 %v2694_v0 }
0x1945   :  { %v1301_v27 = vpop.f32.mrf.mxu1 }
0x1946   :  { %v1306_v28 = vrot.slane %v1301_v27, 6 }
0x1947   :  { %v2403_v29 = vpop.f32.mrf.mxu1 }
0x1948   :  { %v1308_v30 = vadd.f32 %v1306_v28, %v3012_v6 }
0x194a   :  { %2564 = vtanh.f32 %v1308_v30  ;;  %v2160_v31 = vmul.f32 -1.442695, %v1308_v30 }
0x194c   :  { %2566 = vpow2.f32 %v2160_v31 }
0x1957   :  { %v2565_v17 = vpop.eup %2564 }
0x1958   :  { %1321 = vrot.lane.b32.xlu1 %v2565_v17, %s2696_s2 }
0x1959   :  { %v2567_v33 = vpop.eup %2566 }
0x195a   :  { %v1312_v34 = vadd.f32 1.0, %v2567_v33 }
0x195c   :  { %2568 = vrcp.f32 %v1312_v34 }
0x1969   :  { %v2569_v35 = vpop.eup %2568 }
0x196a   :  { %v1319_v39 = vmul.f32 %v2569_v35, %v1317_v38 }
0x19ca   :  { %v1322_v36 = vpop.permute.xlu1 %1321 }
0x19cb   :  { %v1324_v37 = vmul.f32 %v2569_v35, %v1322_v36 }
0x19cd   :  { %1326 = vrot.lane.b32.xlu0 %v1324_v37, %s2697_s3 }
0x1a3f   :  { %v1327_v40 = vpop.permute.xlu0 %1326 }
0x1a40   :  { %v1329_v41 = vadd.f32 %v1327_v40, %v1319_v39 }
0x1a42   :  { %2570 = vtanh.f32 %v1329_v41  ;;  %v1428_v58 = vrot.slane %v1329_v41, 6 }
0x1a4f   :  { %v2571_v42 = vpop.eup %2570 }
0x1a50   :  { %1332 = vrot.lane.b32.xlu1 %v2571_v42, %s2696_s2 }
0x1ac2   :  { %v1333_v43 = vpop.permute.xlu1 %1332 }
0x1ac3   :  { %v3034_v44 = vmul.f32 %v2569_v35, %v1333_v43 }
0x1ac5   :  { %v1341_v14 = vrot.slane %v3034_v44, 2 }
0x1ac7   :  { %1342 = vrot.lane.b32.xlu0 %v1341_v14, %s2697_s3 }
0x1b39   :  { %v1343_v45 = vpop.permute.xlu0 %1342 }
0x1b3a   :  { %2413 = vmatmul.mubr.msk.f32.vlgmr.msra.gmra.mxu0 %vm78_vm1, %v1343_v45 }
0x1b3b   :  { %2427 = vmatpush3.msra.mxu0 %v2960_v53  ;;  %2434 = vmatprep.mubr.msk.f32.mxu0 %vm2695_vm0, %v2694_v0 }
0x1b3c   :  { %2428 = vmatprep.subr.mxu0 %v2694_v0 }
0x1b3d   :  { %2429 = vmatpush3.msra.mxu0 %v2963_v55 }
0x1b3e   :  { %2430 = vmatprep.subr.mxu0 %v2694_v0 }
0x1b3f   :  { %2431 = vmatpush3.msra.mxu0 %v2966_v3 }
0x1b40   :  { %2432 = vmatprep.subr.mxu0 %v2694_v0 }
0x1b41   :  { %2433 = vmatpush3.msra.mxu0 %v2972_v56 }
0x1b42   :  { %2448 = vmatprep.subr.mxu0 %v2694_v0 }
0x1bfa   :  { %v1412_v46 = vpop.f32.mrf.mxu0 }
0x1bfb   :  { %v1417_v47 = vrot.slane %v1412_v46, 4 }
0x1bfc   :  { %v2414_v48 = vpop.f32.mrf.mxu0 }
0x1bfd   :  { %v1419_v49 = vadd.f32 %v1417_v47, %v3012_v6 }
0x1bff   :  { %2572 = vtanh.f32 %v1419_v49  ;;  %v2162_v32 = vmul.f32 -1.442695, %v1419_v49 }
0x1c01   :  { %2574 = vpow2.f32 %v2162_v32 }
0x1c0c   :  { %v2573_v50 = vpop.eup %2572 }
0x1c0d   :  { %1432 = vrot.lane.b32.xlu1 %v2573_v50, %s2696_s2 }
0x1c0e   :  { %v2575_v51 = vpop.eup %2574 }
0x1c0f   :  { %v1423_v52 = vadd.f32 1.0, %v2575_v51 }
0x1c11   :  { %2576 = vrcp.f32 %v1423_v52 }
0x1c1e   :  { %v2577_v54 = vpop.eup %2576 }
0x1c1f   :  { %v1430_v59 = vmul.f32 %v2577_v54, %v1428_v58 }
0x1c7f   :  { %v1433_v11 = vpop.permute.xlu1 %1432 }
0x1c80   :  { %v1435_v57 = vmul.f32 %v2577_v54, %v1433_v11 }
0x1c82   :  { %1437 = vrot.lane.b32.xlu0 %v1435_v57, %s2697_s3 }
0x1cf4   :  { %v1438_v7 = vpop.permute.xlu0 %1437 }
0x1cf5   :  { %v1440_v60 = vadd.f32 %v1438_v7, %v1430_v59 }
0x1cf7   :  { %2578 = vtanh.f32 %v1440_v60  ;;  %v1539_v22 = vrot.slane %v1440_v60, 6 }
0x1d04   :  { %v2579_v61 = vpop.eup %2578 }
0x1d05   :  { %1443 = vrot.lane.b32.xlu1 %v2579_v61, %s2696_s2 }
0x1d77   :  { %v1444_v9 = vpop.permute.xlu1 %1443 }
0x1d78   :  { %v3053_v62 = vmul.f32 %v2577_v54, %v1444_v9 }
0x1d7a   :  { %v1452_v63 = vrot.slane %v3053_v62, 4 }
0x1d7c   :  { %1453 = vrot.lane.b32.xlu0 %v1452_v63, %s2697_s3 }
0x1dee   :  { %v1454_v1 = vpop.permute.xlu0 %1453 }
0x1def   :  { %2424 = vmatmul.mubr.msk.f32.vlgmr.msra.gmra.mxu1 %vm78_vm1, %v1454_v1 }
0x1df0   :  { %2438 = vmatpush3.msra.mxu1 %v2960_v53  ;;  %2445 = vmatprep.mubr.msk.f32.mxu1 %vm2695_vm0, %v2694_v0 }
0x1df1   :  { %2439 = vmatprep.subr.mxu1 %v2694_v0 }
0x1df2   :  { %2440 = vmatpush3.msra.mxu1 %v2963_v55 }
0x1df3   :  { %2441 = vmatprep.subr.mxu1 %v2694_v0 }
0x1df4   :  { %2442 = vmatpush3.msra.mxu1 %v2966_v3 }
0x1df5   :  { %2443 = vmatprep.subr.mxu1 %v2694_v0 }
0x1df6   :  { %2444 = vmatpush3.msra.mxu1 %v2972_v56 }
0x1df7   :  { %2459 = vmatprep.subr.mxu1 %v2694_v0 }
0x1eaf   :  { %v1523_v5 = vpop.f32.mrf.mxu1 }
0x1eb0   :  { %v1528_v8 = vrot.slane %v1523_v5, 2 }
0x1eb1   :  { %v2425_v10 = vpop.f32.mrf.mxu1 }
0x1eb2   :  { %v1530_v12 = vadd.f32 %v1528_v8, %v3012_v6 }
0x1eb4   :  { %2580 = vtanh.f32 %v1530_v12  ;;  %v2164_v15 = vmul.f32 -1.442695, %v1530_v12 }
0x1eb6   :  { %2582 = vpow2.f32 %v2164_v15 }
0x1ec1   :  { %v2581_v13 = vpop.eup %2580 }
0x1ec2   :  { %1543 = vrot.lane.b32.xlu1 %v2581_v13, %s2696_s2 }
0x1ec3   :  { %v2583_v16 = vpop.eup %2582 }
0x1ec4   :  { %v1534_v18 = vadd.f32 1.0, %v2583_v16 }
0x1ec6   :  { %2584 = vrcp.f32 %v1534_v18 }
0x1ed3   :  { %v2585_v19 = vpop.eup %2584 }
0x1ed4   :  { %v1541_v23 = vmul.f32 %v2585_v19, %v1539_v22 }
0x1f34   :  { %v1544_v20 = vpop.permute.xlu1 %1543 }
0x1f35   :  { %v1546_v21 = vmul.f32 %v2585_v19, %v1544_v20 }
0x1f37   :  { %1548 = vrot.lane.b32.xlu0 %v1546_v21, %s2697_s3 }
0x1fa9   :  { %v1549_v24 = vpop.permute.xlu0 %1548 }
0x1faa   :  { %v1551_v25 = vadd.f32 %v1549_v24, %v1541_v23 }
0x1fac   :  { %2586 = vtanh.f32 %v1551_v25  ;;  %v1647_v40 = vrot.slane %v1551_v25, 6 }
0x1fb9   :  { %v2587_v6 = vpop.eup %2586 }
0x1fba   :  { %1554 = vrot.lane.b32.xlu1 %v2587_v6, %s2696_s2 }
0x202c   :  { %v1555_v26 = vpop.permute.xlu1 %1554 }
0x202d   :  { %v3072_v27 = vmul.f32 %v2585_v19, %v1555_v26 }
0x202f   :  { %v1563_v28 = vrot.slane %v3072_v27, 6 }
0x2031   :  { %1564 = vrot.lane.b32.xlu0 %v1563_v28, %s2697_s3 }
0x20a3   :  { %v1565_v29 = vpop.permute.xlu0 %1564 }
0x20a4   :  { %2435 = vmatmul.mubr.msk.f32.vlgmr.msra.gmra.mxu0 %vm78_vm1, %v1565_v29 }
0x20a5   :  { %2449 = vmatpush3.msra.mxu0 %v2960_v53  ;;  %2456 = vmatprep.mubr.msk.f32.mxu0 %vm2695_vm0, %v2694_v0 }
0x20a6   :  { %2450 = vmatprep.subr.mxu0 %v2694_v0 }
0x20a7   :  { %2451 = vmatpush3.msra.mxu0 %v2963_v55 }
0x20a8   :  { %2452 = vmatprep.subr.mxu0 %v2694_v0 }
0x20a9   :  { %2453 = vmatpush3.msra.mxu0 %v2966_v3 }
0x20aa   :  { %2454 = vmatprep.subr.mxu0 %v2694_v0 }
0x20ab   :  { %2455 = vmatpush3.msra.mxu0 %v2972_v56 }
0x20ac   :  { %2470 = vmatprep.subr.mxu0 %v2694_v0 }
0x2164   :  { %v1634_v30 = vpop.f32.mrf.mxu0 }
0x2165   :  { %v1638_v17 = vadd.f32 %v1634_v30, %v3010_v2 }
0x2166   :  { %v2436_v31 = vpop.f32.mrf.mxu0 }
0x2167   :  { %2588 = vtanh.f32 %v1638_v17  ;;  %v2166_v34 = vmul.f32 -1.442695, %v1638_v17 }
0x2169   :  { %2590 = vpow2.f32 %v2166_v34 }
0x2174   :  { %v2589_v33 = vpop.eup %2588 }
0x2175   :  { %1651 = vrot.lane.b32.xlu1 %v2589_v33, %s2696_s2 }
0x2176   :  { %v2591_v35 = vpop.eup %2590 }
0x2177   :  { %v1642_v36 = vadd.f32 1.0, %v2591_v35 }
0x2179   :  { %2592 = vrcp.f32 %v1642_v36 }
0x2186   :  { %v2593_v37 = vpop.eup %2592 }
0x2187   :  { %v1649_v41 = vmul.f32 %v2593_v37, %v1647_v40 }
0x21e7   :  { %v1652_v38 = vpop.permute.xlu1 %1651 }
0x21e8   :  { %v1654_v39 = vmul.f32 %v2593_v37, %v1652_v38 }
0x21ea   :  { %1656 = vrot.lane.b32.xlu0 %v1654_v39, %s2697_s3 }
0x225c   :  { %v1657_v42 = vpop.permute.xlu0 %1656 }
0x225d   :  { %v1659_v43 = vadd.f32 %v1657_v42, %v1649_v41 }
0x225f   :  { %2594 = vtanh.f32 %v1659_v43 }
0x226c   :  { %v2595_v14 = vpop.eup %2594 }
0x226d   :  { %1662 = vrot.lane.b32.xlu1 %v2595_v14, %s2696_s2 }
0x22df   :  { %v1663_v45 = vpop.permute.xlu1 %1662 }
0x22e0   :  { %v1665_v46 = vmul.f32 %v2593_v37, %v1663_v45  ;;  %v2009_v45 = vld [vmem:[%s3168_s7 + $0x10] sm:$0xff] }
0x22e2   :  { %1667 = vrot.lane.b32.xlu0 %v1665_v46, %s2697_s3  ;;  %v2008_v46 = vld [vmem:[%s3168_s7 + $0x8] sm:$0xff] }
0x2354   :  { %v1668_v47 = vpop.permute.xlu0 %1667 }
0x2355   :  { %2446 = vmatmul.mubr.msk.f32.vlgmr.msra.gmra.mxu1 %vm78_vm1, %v1668_v47 }
0x2356   :  { %2460 = vmatpush3.msra.mxu1 %v2960_v53  ;;  %2467 = vmatprep.mubr.msk.f32.mxu1 %vm2695_vm0, %v2694_v0 }
0x2357   :  { %2461 = vmatprep.subr.mxu1 %v2694_v0 }
0x2358   :  { %2462 = vmatpush3.msra.mxu1 %v2963_v55 }
0x2359   :  { %2463 = vmatprep.subr.mxu1 %v2694_v0 }
0x235a   :  { %2464 = vmatpush3.msra.mxu1 %v2966_v3 }
0x235b   :  { %2465 = vmatprep.subr.mxu1 %v2694_v0 }
0x235c   :  { %2466 = vmatpush3.msra.mxu1 %v2972_v56  ;;  %v1755_v56 = vrot.slane %v1659_v43, 6 }
0x2415   :  { %v1739_v48 = vpop.f32.mrf.mxu1 }
0x2416   :  { %v1744_v49 = vrot.slane %v1739_v48, 6  ;;  %v2007_v48 = vld [vmem:[%s3168_s7] sm:$0xff] }
0x2417   :  { %v2447_v50 = vpop.f32.mrf.mxu1 }
0x2418   :  { %v1746_v53 = vadd.f32 %v1744_v49, %v3010_v2 }
0x241a   :  { %2596 = vtanh.f32 %v1746_v53  ;;  %v2168_v51 = vmul.f32 -1.442695, %v1746_v53  ;;  %v2001_v53 = vrot.slane %v2978_v4, 6 }
0x241c   :  { %2598 = vpow2.f32 %v2168_v51 }
0x2427   :  { %v2597_v32 = vpop.eup %2596 }
0x2428   :  { %1759 = vrot.lane.b32.xlu1 %v2597_v32, %s2696_s2 }
0x2429   :  { %v2599_v55 = vpop.eup %2598 }
0x242a   :  { %v1750_v52 = vadd.f32 1.0, %v2599_v55 }
0x242c   :  { %2600 = vrcp.f32 %v1750_v52 }
0x2439   :  { %v2601_v54 = vpop.eup %2600 }
0x243a   :  { %v1757_v57 = vmul.f32 %v2601_v54, %v1755_v56 }
0x249a   :  { %v1760_v3 = vpop.permute.xlu1 %1759 }
0x249b   :  { %v1762_v11 = vmul.f32 %v2601_v54, %v1760_v3 }
0x249d   :  { %1764 = vrot.lane.b32.xlu0 %v1762_v11, %s2697_s3 }
0x250f   :  { %v1765_v58 = vpop.permute.xlu0 %1764 }
0x2510   :  { %v1767_v59 = vadd.f32 %v1765_v58, %v1757_v57 }
0x2512   :  { %2602 = vtanh.f32 %v1767_v59  ;;  %v1866_v21 = vrot.slane %v1767_v59, 6 }
0x251f   :  { %v2603_v7 = vpop.eup %2602 }
0x2520   :  { %1770 = vrot.lane.b32.xlu1 %v2603_v7, %s2696_s2 }
0x2592   :  { %v1771_v60 = vpop.permute.xlu1 %1770 }
0x2593   :  { %v3106_v61 = vmul.f32 %v2601_v54, %v1771_v60 }
0x2595   :  { %v1779_v9 = vrot.slane %v3106_v61, 2 }
0x2597   :  { %1780 = vrot.lane.b32.xlu0 %v1779_v9, %s2697_s3 }
0x2609   :  { %v1781_v63 = vpop.permute.xlu0 %1780 }
0x260a   :  { %2457 = vmatmul.mubr.msk.f32.vlgmr.msra.gmra.mxu0 %vm78_vm1, %v1781_v63  ;;  %v2698_v63 = vmov 1983009808  }
0x260b   :  { %2478 = vmatprep.mubr.msk.f32.mxu0 %vm2695_vm0, %v2694_v0 }
0x26ca   :  { %v1850_v1 = vpop.f32.mrf.mxu0 }
0x26cb   :  { %v1855_v5 = vrot.slane %v1850_v1, 4  ;;  %v2107_v1 = vunpack.c.l.s4 %v2698_v63 }
0x26cc   :  { %v2458_v8 = vpop.f32.mrf.mxu0 }
0x26cd   :  { %v1857_v10 = vadd.f32 %v1855_v5, %v3010_v2  ;;  %v2109_v5 = vlaneseq }
0x26cf   :  { %2604 = vtanh.f32 %v1857_v10  ;;  %v2170_v13 = vmul.f32 -1.442695, %v1857_v10  ;;  %v2108_v10 = vunpack.c.0.s8 %v2107_v1 }
0x26d1   :  { %2606 = vpow2.f32 %v2170_v13 }
0x26dc   :  { %v2605_v12 = vpop.eup %2604 }
0x26dd   :  { %1870 = vrot.lane.b32.xlu1 %v2605_v12, %s2696_s2  ;;  %v2110_v12 = vshrl.u32 %v2109_v5, 7 }
0x26de   :  { %v2607_v15 = vpop.eup %2606 }
0x26df   :  { %v1861_v16 = vadd.f32 1.0, %v2607_v15  ;;  %v2111_v13 = vsub.s32 %v2108_v10, %v2110_v12 }
0x26e1   :  { %2608 = vrcp.f32 %v1861_v16 }
0x26ee   :  { %v2609_v18 = vpop.eup %2608 }
0x26ef   :  { %v1868_v22 = vmul.f32 %v2609_v18, %v1866_v21 }
0x274f   :  { %v1871_v19 = vpop.permute.xlu1 %1870 }
0x2750   :  { %v1873_v20 = vmul.f32 %v2609_v18, %v1871_v19 }
0x2752   :  { %1875 = vrot.lane.b32.xlu0 %v1873_v20, %s2697_s3 }
0x27c4   :  { %v1876_v23 = vpop.permute.xlu0 %1875 }
0x27c5   :  { %v1878_v24 = vadd.f32 %v1876_v23, %v1868_v22 }
0x27c7   :  { %2610 = vtanh.f32 %v1878_v24  ;;  %v1977_v41 = vrot.slane %v1878_v24, 6 }
0x27d4   :  { %v2611_v25 = vpop.eup %2610 }
0x27d5   :  { %1881 = vrot.lane.b32.xlu1 %v2611_v25, %s2696_s2 }
0x2847   :  { %v1882_v6 = vpop.permute.xlu1 %1881 }
0x2848   :  { %v1884_v26 = vmul.f32 %v2609_v18, %v1882_v6 }
0x284a   :  { %v1890_v28 = vrot.slane %v1884_v26, 4 }
0x284c   :  { %1891 = vrot.lane.b32.xlu0 %v1890_v28, %s2697_s3 }
0x28be   :  { %v1892_v29 = vpop.permute.xlu0 %1891 }
0x28bf   :  { %2468 = vmatmul.mubr.msk.f32.vlgmr.msra.gmra.mxu1 %vm78_vm1, %v1892_v29 }
0x297f   :  { %v1961_v30 = vpop.f32.mrf.mxu1 }
0x2980   :  { %v1966_v17 = vrot.slane %v1961_v30, 2 }
0x2981   :  { %v2469_v31 = vpop.f32.mrf.mxu1 }
0x2982   :  { %v1968_v33 = vadd.f32 %v1966_v17, %v3010_v2  ;;  %v2010_v2 = vld [vmem:[%s3168_s7 + $0x18] sm:$0xff] }
0x2983   :  { %2471 = vmatpush3.msra.mxu0 %v2010_v2 }
0x2984   :  { %2612 = vtanh.f32 %v1968_v33  ;;  %v2172_v35 = vmul.f32 -1.442695, %v1968_v33  ;;  %2472 = vmatprep.subr.mxu0 %v2694_v0 }
0x2985   :  { %2473 = vmatpush3.msra.mxu0 %v2009_v45 }
0x2986   :  { %2614 = vpow2.f32 %v2172_v35  ;;  %2474 = vmatprep.subr.mxu0 %v2694_v0 }
0x2987   :  { %2475 = vmatpush3.msra.mxu0 %v2008_v46 }
0x2988   :  { %2476 = vmatprep.subr.mxu0 %v2694_v0  ;;  %v2173_v0 = vld [vmem:[%s3169_s8] ss:$0 sm:$0xff]  ;;  %s2699_s8 = smov [#allocation9]  }
0x2989   :  { %2477 = vmatpush3.msra.mxu0 %v2007_v48  ;;  %s2124_s26 = sshll.u32 %s2699_s8, 4  ;;  %s2125_s26 = int_to_ptr.vmem [resolvable:$true] %s2124_s26 }
0x298a   :  { %s2664_s27 = scalar_lea.vmem %s2125_s26, 64  ;;  %p2669_p11 = scmp.lt.s32.totalorder %s2125_s26, %s2125_s26 }
0x298b   :  { %p2665_p10 = scmp.ne.s32.totalorder %s2125_s26, %s2664_s27  ;;  %p2670_p12 = scmp.lt.s32.totalorder %s2664_s27, %s2664_s27 }
0x298d   :  { %p2671_p13 = por %p2670_p12, %p2669_p11 }
0x298f   :  { %p2672_p0 = pnand %p2671_p13, %p2665_p10 }
0x2991   :  { %v2613_v34 = vpop.eup %2612 }
0x2992   :  { %1981 = vrot.lane.b32.xlu1 %v2613_v34, %s2696_s2 }
0x2993   :  { %v2615_v36 = vpop.eup %2614 }
0x2994   :  { %v1972_v37 = vadd.f32 1.0, %v2615_v36 }
0x2996   :  { %2616 = vrcp.f32 %v1972_v37 }
0x29a3   :  { %v2617_v38 = vpop.eup %2616 }
0x29a4   :  { %v1979_v42 = vmul.f32 %v2617_v38, %v1977_v41 }
0x2a04   :  { %v1982_v39 = vpop.permute.xlu1 %1981 }
0x2a05   :  { %v1984_v40 = vmul.f32 %v2617_v38, %v1982_v39 }
0x2a07   :  { %1986 = vrot.lane.b32.xlu0 %v1984_v40, %s2697_s3 }
0x2a79   :  { %v1987_v43 = vpop.permute.xlu0 %1986 }
0x2a7a   :  { %v1989_v14 = vadd.f32 %v1987_v43, %v1979_v42 }
0x2a7c   :  { %2618 = vtanh.f32 %v1989_v14 }
0x2a89   :  { %v2619_v47 = vpop.eup %2618 }
0x2a8a   :  { %1992 = vrot.lane.b32.xlu1 %v2619_v47, %s2696_s2 }
0x2afc   :  { %v1993_v49 = vpop.permute.xlu1 %1992 }
0x2afd   :  { %v1995_v50 = vmul.f32 %v2617_v38, %v1993_v49 }
0x2aff   :  { %v2003_v32 = vrot.slane %v1995_v50, 4 }
0x2b01   :  { %v2006_v51 = vsel %vm2005_vm6, %v2001_v53, %v2003_v32 }
0x2b02   :  { %2019 = vrot.lane.b32.xlu0 %v2006_v51, %s2697_s3 }
0x2b06   :  { %1337 = vrot.lane.b32.xlu0 %v3034_v44, %s2697_s3 }
0x2b74   :  { %v2020_v55 = vpop.permute.xlu0 %2019 }
0x2b75   :  { %2479 = vmatmul.mubr.msk.f32.vlgmr.msra.gmra.mxu0 %vm78_vm1, %v2020_v55 }
0x2b78   :  { %v1338_v52 = vpop.permute.xlu0 %1337 }
0x2c35   :  { %v2089_v54 = vpop.f32.mrf.mxu0 }
0x2c36   :  { %v2090_v3 = vadd.f32 %v2173_v0, %v2089_v54 }
0x2c37   :  { %v2480_v11 = vpop.f32.mrf.mxu0 }
0x2c38   :  { %v2094_v4 = vsel %vm2093_vm7, %v2090_v3, -inf }
0x2c39   :  { %2095 = vmax.xlane.f32.xlu1 %v2094_v4 }
0x2c4a   :  { %1448 = vrot.lane.b32.xlu1 %v3053_v62, %s2697_s3 }
0x2c4e   :  { %1559 = vrot.lane.b32.xlu1 %v3072_v27, %s2697_s3 }
0x2c52   :  { %1886 = vrot.lane.b32.xlu1 %v1884_v26, %s2697_s3 }
0x2cc2   :  { %v2096_v44 = vpop.xlane.xlu1 %2095 }
0x2cc3   :  { %v2097_v56 = vsub.f32 %v2090_v3, %v2096_v44 }
0x2cc5   :  { %v2098_v57 = vmul.f32 1.442695, %v2097_v56 }
0x2cc6   :  { %v1449_v58 = vpop.permute.xlu1 %1448 }
0x2cc7   :  { %2620 = vpow2.f32 %v2098_v57 }
0x2cca   :  { %v1560_v59 = vpop.permute.xlu1 %1559 }
0x2cce   :  { %v1887_v7 = vpop.permute.xlu1 %1886 }
0x2cd4   :  { %v2621_v60 = vpop.eup %2620 }
0x2cd5   :  { %v2100_v9 = vsel %vm2093_vm7, %v2621_v60, 0.0 }
0x2cd6   :  { %2101 = vadd.xlane.f32.xlu0 %v2100_v9 }
0x2cec   :  { %1775 = vrot.lane.b32.xlu0 %v3106_v61, %s2697_s3 }
0x2cf0   :  { %1997 = vrot.lane.b32.xlu0 %v1995_v50, %s2697_s3 }
0x2d5f   :  { %v2102_v62 = vpop.xlane.xlu0 %2101 }
0x2d60   :  { %2622 = vrcp.f32 %v2102_v62 }
0x2d63   :  { %v1776_v27 = vpop.permute.xlu0 %1775 }
0x2d67   :  { %v1998_v8 = vpop.permute.xlu0 %1997 }
0x2d6d   :  { %v2623_v15 = vpop.eup %2622 }
0x2d6e   :  { %v2104_v16 = vmul.f32 %v2623_v15, %v2621_v60 }
0x2d70   :  { %v2112_v18 = vrot.slane %v2104_v16, %v2111_v13 }
0x2d72   :  { %v2113_v19 = vcombine.high %v2112_v18, %v2112_v18  ;;  %2117 = vst.msk [vmem:[#allocation9] sm:$0x3] %vm2116_vm8, %v2112_v18 }
0x2d74   :  { %2118 = vst.msk [vmem:[#allocation9 + $0x2] sm:$0x3] %vm2116_vm8, %v2113_v19 }
0x2d75   :  { %2675 = shalt.err (!%p2672_p0)
}
0x2d76   :  { %s2700_s28 = smov 2  }
0x2d77   :  { %2130 = dma.vmem_to_hbm [thread:$0]  %s2125_s26, 64, %s3170_s9, [#allocation6], %s2697_s3, %s2697_s3, %s2700_s28  }
0x2d78   :  { %2688 = dma.done.wait [#allocation6], 64  }
0x2d79   :  { %2689 = vsyncadd [#allocation6], 4294967232 }
0x2d7a   :  { %2134 = vsyncpa [#allocation5], 1 }
0x2d7b   :  { %2135 = vsyncpa [#allocation8], 1 }
0x2d7c   :  { %2136 = vsyncpa [#allocation6], 1 }

</bundles_post_ra>
